<compile_context>
chip_gen: v7x
topology: tpu7x:2x2x1
jax: 0.10.0
libtpu: 0.0.40
codegen_flags: <defaults>
</compile_context>

<pallas_src>
import functools
import math

import jax
import jax.numpy as jnp
import numpy as np
from jax.experimental import pallas as pl
from jax.experimental.pallas import tpu as pltpu


# ----------------------------------------------------------------------------
# Pallas kernel: full residual-MLP hot path + fused boundary control.
# In-kernel layout: activations [m, tn] (batch on lanes), weights [out, in],
# biases [out, 1].  x_ref is [dpad, tn] with rows 0..dim-1 = x^T, rest zero.
# ----------------------------------------------------------------------------
def _resnet_tanh_kernel(x_ref, w1_ref, wh_ref, bh_ref, wout_ref, y_ref,
                        *, boundary_control_type, dim, mxu_bf16):
    f32 = jnp.float32
    cdt = jnp.bfloat16 if mxu_bf16 else f32

    x_pad = x_ref[...].astype(f32)                  # [dpad, tn]
    dpad, tn = x_pad.shape
    m = wh_ref.shape[1]

    # Residual seed s = (x @ Ix)^T : rows 0..dim-1 hold x^T, the rest are 0.
    if dpad < m:
        s = jnp.concatenate(
            [x_pad, jnp.zeros((m - dpad, tn), f32)], axis=0)   # [m, tn]
    else:
        s = x_pad

    def dot(w, h):
        # MXU matmul; bf16 operands (optional) with f32 accumulation.
        return jnp.dot(w.astype(cdt), h.astype(cdt),
                       preferred_element_type=f32)

    # fc1 / fc2 + residual   (w1 consumes the dpad-wide padded input)
    y = jnp.tanh(dot(w1_ref[...], x_pad) + bh_ref[0])
    y = jnp.tanh(dot(wh_ref[0], y) + bh_ref[1]) + s
    s = y
    # fc3 / fc4 + residual
    y = jnp.tanh(dot(wh_ref[1], y) + bh_ref[2])
    y = jnp.tanh(dot(wh_ref[2], y) + bh_ref[3]) + s
    s = y
    # fc5 / fc6 + residual
    y = jnp.tanh(dot(wh_ref[3], y) + bh_ref[4])
    y = jnp.tanh(dot(wh_ref[4], y) + bh_ref[5]) + s

    # outlayer: Linear(m, 1, bias=False) -> lane-dense [1, tn]
    out = dot(wout_ref[...], y)

    if boundary_control_type == "none":
        y_ref[...] = out.astype(y_ref.dtype)
        return

    x0 = x_pad[0:1, :]                              # [1, tn]
    x1 = x_pad[1:2, :]                              # [1, tn]
    half_pi = np.pi / 2.0

    if boundary_control_type == "net_u":
        if dim > 2:
            sum_w = jnp.sum(x_pad[2:dim, :], axis=0, keepdims=True)
        else:
            sum_w = jnp.zeros_like(x0)
        arg = jnp.exp(2.0 * x0) - 4.0 * x1 * (1.0 + jnp.exp(-(sum_w * sum_w)))
        base = jnp.where(arg > 0, 1.0, 0.0).astype(f32)   # g(..., if_cuda=True)
        sinx = jnp.sin(half_pi * x0) * jnp.sin(half_pi * x1)
        y_ref[...] = (sinx * out + base * (1.0 - sinx)).astype(y_ref.dtype)
    else:  # "net_v"
        cosx = jnp.cos(half_pi * x0) * jnp.cos(half_pi * x1)
        y_ref[...] = (cosx * out).astype(y_ref.dtype)


# ----------------------------------------------------------------------------
# Wrapper
# ----------------------------------------------------------------------------
def resnet_tanh_forward(x, params, *, boundary_control_type="none",
                        tn=2048, mxu_bf16=True):
    """Pallas forward pass of ResNet_Tanh.

    x: [N, dim] float32 (any N; padded internally to a multiple of the row
       tile).  params: dict with w1..w6 ([out, in]), b1..b6 ([out, 1]),
       wout ([1, m]).
    mxu_bf16=True runs the matmuls with bf16 operands / f32 accumulation
    (fast MXU path); set False for bit-faithful f32 matmuls.
    """
    if boundary_control_type not in ("none", "net_u", "net_v"):
        # TODO(synk): reference forward() has no branch for 'cube' (or any
        # other type) and implicitly returns None; we mirror that behaviour.
        return None

    N, dim = x.shape
    m = params["w1"].shape[0]
    assert dim <= m, "hidden width must be >= input dim"

    dpad = max(8, ((dim + 7) // 8) * 8)       # sublane-aligned input rows
    assert dpad <= m

    # Row tile: multiple of 128, no bigger than the (128-padded) batch, so
    # small batches run a single grid step and large ones amortize overhead.
    tn = max(128, (min(tn, ((N + 127) // 128) * 128) // 128) * 128)
    n_tiles = pl.cdiv(N, tn)
    Npad = n_tiles * tn

    # Feature-major, sublane-padded input: [dpad, Npad]; rows 0..dim-1 = x^T.
    # NOTE: for training loops this transpose/pad (one small HBM pass) can be
    # hoisted out of the hot path and reused across forward calls.
    x_fm = jnp.pad(x.astype(jnp.float32).T, ((0, dpad - dim), (0, Npad - N)))

    # fc1 weight gets zero columns to consume the dpad-wide padded input.
    w1p = jnp.pad(params["w1"], ((0, 0), (0, dpad - dim)))          # [m, dpad]
    wh = jnp.stack([params["w2"], params["w3"], params["w4"],
                    params["w5"], params["w6"]])                    # [5, m, m]
    bh = jnp.stack([params["b1"], params["b2"], params["b3"],
                    params["b4"], params["b5"], params["b6"]])      # [6, m, 1]
    wout = params["wout"]                                           # [1, m]

    kernel = functools.partial(_resnet_tanh_kernel,
                               boundary_control_type=boundary_control_type,
                               dim=dim, mxu_bf16=mxu_bf16)

    y = pl.pallas_call(
        kernel,
        out_shape=jax.ShapeDtypeStruct((1, Npad), jnp.float32),
        grid_spec=pltpu.PrefetchScalarGridSpec(
            num_scalar_prefetch=0,
            grid=(n_tiles,),
            in_specs=[
                pl.BlockSpec((dpad, tn), lambda i: (0, i)),   # streamed x
                pl.BlockSpec(w1p.shape, lambda i: (0, 0)),    # resident
                pl.BlockSpec(wh.shape, lambda i: (0, 0, 0)),  # resident
                pl.BlockSpec(bh.shape, lambda i: (0, 0, 0)),  # resident
                pl.BlockSpec(wout.shape, lambda i: (0, 0)),   # resident
            ],
            out_specs=pl.BlockSpec((1, tn), lambda i: (0, i)),
        ),
        compiler_params=pltpu.CompilerParams(
            dimension_semantics=("parallel",)),
    )(x_fm, w1p, wh, bh, wout)

    return y[0, :N]


# ----------------------------------------------------------------------------
# Parameter construction (deterministic, PyTorch nn.Linear-style init),
# stored in [out, in] / [out, 1] layout (PyTorch-native, kernel-native).
# ----------------------------------------------------------------------------
def init_params(key, dim, m):
    def linear(key, fan_in, fan_out, bias=True):
        kw, kb = jax.random.split(key)
        bound = 1.0 / math.sqrt(fan_in)
        w = jax.random.uniform(kw, (fan_out, fan_in), jnp.float32, -bound, bound)
        if bias:
            b = jax.random.uniform(kb, (fan_out, 1), jnp.float32, -bound, bound)
            return w, b
        return w, None

    keys = jax.random.split(key, 7)
    p = {}
    p["w1"], p["b1"] = linear(keys[0], dim, m)
    p["w2"], p["b2"] = linear(keys[1], m, m)
    p["w3"], p["b3"] = linear(keys[2], m, m)
    p["w4"], p["b4"] = linear(keys[3], m, m)
    p["w5"], p["b5"] = linear(keys[4], m, m)
    p["w6"], p["b6"] = linear(keys[5], m, m)
    p["wout"], _ = linear(keys[6], m, 1, bias=False)
    return p


# Pure-JAX reference (mirrors the PyTorch forward).  mxu_bf16=True mirrors the
# kernel's bf16-operand / f32-accumulation matmul path for tight validation.
def reference_forward(x, p, boundary_control_type="none", mxu_bf16=False):
    f32 = jnp.float32
    cdt = jnp.bfloat16 if mxu_bf16 else f32
    m = p["w1"].shape[0]
    dim = x.shape[1]

    def lin(h, w, b=None):
        out = jnp.dot(h.astype(cdt), w.T.astype(cdt),
                      preferred_element_type=f32)
        if b is not None:
            out = out + b.T
        return out

    xf = x.astype(f32)
    s = jnp.pad(xf, ((0, 0), (0, m - dim)))       # x @ Ix
    y = jnp.tanh(lin(xf, p["w1"], p["b1"]))
    y = jnp.tanh(lin(y, p["w2"], p["b2"])) + s
    s = y
    y = jnp.tanh(lin(y, p["w3"], p["b3"]))
    y = jnp.tanh(lin(y, p["w4"], p["b4"])) + s
    s = y
    y = jnp.tanh(lin(y, p["w5"], p["b5"]))
    y = jnp.tanh(lin(y, p["w6"], p["b6"])) + s
    y = lin(y, p["wout"])[:, 0]

    if boundary_control_type == "none":
        return y
    elif boundary_control_type == "net_u":
        sum_w_2 = jnp.sum(xf[:, 2:], axis=1) ** 2
        arg = jnp.exp(2.0 * xf[:, 0]) - 4.0 * xf[:, 1] * (1.0 + jnp.exp(-sum_w_2))
        base = jnp.where(arg > 0, 1.0, 0.0)
        sinx = jnp.sin(np.pi / 2 * xf[:, 0]) * jnp.sin(np.pi / 2 * xf[:, 1])
        return sinx * y + base * (1.0 - sinx)
    elif boundary_control_type == "net_v":
        return jnp.cos(np.pi / 2 * xf[:, 0]) * jnp.cos(np.pi / 2 * xf[:, 1]) * y
    return None


if __name__ == "__main__":
    N, dim, m = 1024, 2, 32          # batch, input dim, hidden width

    key = jax.random.PRNGKey(0)
    kx, kp = jax.random.split(key)
    x = jax.random.uniform(kx, (N, dim), jnp.float32, -1.0, 1.0)
    params = init_params(kp, dim, m)

    for bct in ("none", "net_u", "net_v"):
        # Bit-faithful f32-matmul path vs f32 reference.
        fwd32 = jax.jit(functools.partial(resnet_tanh_forward,
                                          boundary_control_type=bct,
                                          mxu_bf16=False))
        y32 = jax.block_until_ready(fwd32(x, params))
        np.testing.assert_allclose(
            np.asarray(y32),
            np.asarray(reference_forward(x, params, bct, mxu_bf16=False)),
            rtol=2e-5, atol=2e-5)

        # Fast bf16-MXU path vs matching bf16 / f32-accumulation reference.
        fwd16 = jax.jit(functools.partial(resnet_tanh_forward,
                                          boundary_control_type=bct,
                                          mxu_bf16=True))
        y16 = jax.block_until_ready(fwd16(x, params))
        np.testing.assert_allclose(
            np.asarray(y16),
            np.asarray(reference_forward(x, params, bct, mxu_bf16=True)),
            rtol=1e-4, atol=1e-4)

    print("KERNEL_OK")
</pallas_src>

<mosaic_0001>
module attributes {stable_mosaic.version = 11 : i64} {
  func.func @_resnet_tanh_kernel(%arg0: i32, %arg1: memref<8x1024xf32, #tpu.memory_space<vmem>>, %arg2: memref<32x8xf32, #tpu.memory_space<vmem>>, %arg3: memref<5x32x32xf32, #tpu.memory_space<vmem>>, %arg4: memref<6x32x1xf32, #tpu.memory_space<vmem>>, %arg5: memref<1x32xf32, #tpu.memory_space<vmem>>, %arg6: memref<1x1024xf32, #tpu.memory_space<vmem>>) attributes {dimension_semantics = [#tpu.dimension_semantics<parallel>], iteration_bounds = array<i64: 1>, scalar_prefetch = 0 : i64, scratch_operands = 0 : i64, tpu.core_type = #tpu.core_type<tc>, window_params = [{transform_indices = @transform_0, window_bounds = array<i64: 8, 1024>}, {pipeline_mode = #tpu.pipeline_mode<synchronous>, transform_indices = @transform_1, window_bounds = array<i64: 32, 8>}, {pipeline_mode = #tpu.pipeline_mode<synchronous>, transform_indices = @transform_2, window_bounds = array<i64: 5, 32, 32>}, {pipeline_mode = #tpu.pipeline_mode<synchronous>, transform_indices = @transform_3, window_bounds = array<i64: 6, 32, 1>}, {pipeline_mode = #tpu.pipeline_mode<synchronous>, transform_indices = @transform_4, window_bounds = array<i64: 1, 32>}, {transform_indices = @transform_5, window_bounds = array<i64: 1, 1024>}]} {
    %c0 = arith.constant 0 : index
    %c0_0 = arith.constant 0 : index
    %0 = vector.load %arg1[%c0, %c0_0] : memref<8x1024xf32, #tpu.memory_space<vmem>>, vector<8x1024xf32>
    %cst = arith.constant 0.000000e+00 : f32
    %1 = vector.broadcast %cst : f32 to vector<24x1024xf32>
    %2 = tpu.concatenate %0, %1 in 0 : vector<8x1024xf32>, vector<24x1024xf32> -> vector<32x1024xf32>
    %c0_1 = arith.constant 0 : index
    %c0_2 = arith.constant 0 : index
    %3 = vector.load %arg2[%c0_1, %c0_2] : memref<32x8xf32, #tpu.memory_space<vmem>>, vector<32x8xf32>
    %cst_3 = arith.constant dense<0.000000e+00> : vector<32x1024xf32>
    %4 = tpu.matmul %3, %0, %cst_3 {dimension_numbers = #tpu.dot_dimension_numbers<[1], [0], [0], [1], [0, 0, 1, 1], [], []>} : vector<32x8xf32>, vector<8x1024xf32>, vector<32x1024xf32> -> vector<32x1024xf32>
    %c0_4 = arith.constant 0 : index
    %c0_5 = arith.constant 0 : index
    %c0_6 = arith.constant 0 : index
    %5 = vector.load %arg4[%c0_4, %c0_5, %c0_6] : memref<6x32x1xf32, #tpu.memory_space<vmem>>, vector<1x32x1xf32>
    %6 = vector.shape_cast %5 : vector<1x32x1xf32> to vector<32x1xf32>
    %7 = vector.broadcast %6 : vector<32x1xf32> to vector<32x1024xf32>
    %8 = arith.addf %4, %7 : vector<32x1024xf32>
    %9 = math.tanh %8 : vector<32x1024xf32>
    %c0_7 = arith.constant 0 : index
    %c0_8 = arith.constant 0 : index
    %c0_9 = arith.constant 0 : index
    %10 = vector.load %arg3[%c0_7, %c0_8, %c0_9] : memref<5x32x32xf32, #tpu.memory_space<vmem>>, vector<1x32x32xf32>
    %11 = vector.shape_cast %10 : vector<1x32x32xf32> to vector<32x32xf32>
    %cst_10 = arith.constant dense<0.000000e+00> : vector<32x1024xf32>
    %12 = tpu.matmul %11, %9, %cst_10 {dimension_numbers = #tpu.dot_dimension_numbers<[1], [0], [0], [1], [0, 0, 1, 1], [], []>} : vector<32x32xf32>, vector<32x1024xf32>, vector<32x1024xf32> -> vector<32x1024xf32>
    %c1 = arith.constant 1 : index
    %c0_11 = arith.constant 0 : index
    %c0_12 = arith.constant 0 : index
    %13 = vector.load %arg4[%c1, %c0_11, %c0_12] : memref<6x32x1xf32, #tpu.memory_space<vmem>>, vector<1x32x1xf32>
    %14 = vector.shape_cast %13 : vector<1x32x1xf32> to vector<32x1xf32>
    %15 = vector.broadcast %14 : vector<32x1xf32> to vector<32x1024xf32>
    %16 = arith.addf %12, %15 : vector<32x1024xf32>
    %17 = math.tanh %16 : vector<32x1024xf32>
    %18 = arith.addf %17, %2 : vector<32x1024xf32>
    %c1_13 = arith.constant 1 : index
    %c0_14 = arith.constant 0 : index
    %c0_15 = arith.constant 0 : index
    %19 = vector.load %arg3[%c1_13, %c0_14, %c0_15] : memref<5x32x32xf32, #tpu.memory_space<vmem>>, vector<1x32x32xf32>
    %20 = vector.shape_cast %19 : vector<1x32x32xf32> to vector<32x32xf32>
    %cst_16 = arith.constant dense<0.000000e+00> : vector<32x1024xf32>
    %21 = tpu.matmul %20, %18, %cst_16 {dimension_numbers = #tpu.dot_dimension_numbers<[1], [0], [0], [1], [0, 0, 1, 1], [], []>} : vector<32x32xf32>, vector<32x1024xf32>, vector<32x1024xf32> -> vector<32x1024xf32>
    %c2 = arith.constant 2 : index
    %c0_17 = arith.constant 0 : index
    %c0_18 = arith.constant 0 : index
    %22 = vector.load %arg4[%c2, %c0_17, %c0_18] : memref<6x32x1xf32, #tpu.memory_space<vmem>>, vector<1x32x1xf32>
    %23 = vector.shape_cast %22 : vector<1x32x1xf32> to vector<32x1xf32>
    %24 = vector.broadcast %23 : vector<32x1xf32> to vector<32x1024xf32>
    %25 = arith.addf %21, %24 : vector<32x1024xf32>
    %26 = math.tanh %25 : vector<32x1024xf32>
    %c2_19 = arith.constant 2 : index
    %c0_20 = arith.constant 0 : index
    %c0_21 = arith.constant 0 : index
    %27 = vector.load %arg3[%c2_19, %c0_20, %c0_21] : memref<5x32x32xf32, #tpu.memory_space<vmem>>, vector<1x32x32xf32>
    %28 = vector.shape_cast %27 : vector<1x32x32xf32> to vector<32x32xf32>
    %cst_22 = arith.constant dense<0.000000e+00> : vector<32x1024xf32>
    %29 = tpu.matmul %28, %26, %cst_22 {dimension_numbers = #tpu.dot_dimension_numbers<[1], [0], [0], [1], [0, 0, 1, 1], [], []>} : vector<32x32xf32>, vector<32x1024xf32>, vector<32x1024xf32> -> vector<32x1024xf32>
    %c3 = arith.constant 3 : index
    %c0_23 = arith.constant 0 : index
    %c0_24 = arith.constant 0 : index
    %30 = vector.load %arg4[%c3, %c0_23, %c0_24] : memref<6x32x1xf32, #tpu.memory_space<vmem>>, vector<1x32x1xf32>
    %31 = vector.shape_cast %30 : vector<1x32x1xf32> to vector<32x1xf32>
    %32 = vector.broadcast %31 : vector<32x1xf32> to vector<32x1024xf32>
    %33 = arith.addf %29, %32 : vector<32x1024xf32>
    %34 = math.tanh %33 : vector<32x1024xf32>
    %35 = arith.addf %34, %18 : vector<32x1024xf32>
    %c3_25 = arith.constant 3 : index
    %c0_26 = arith.constant 0 : index
    %c0_27 = arith.constant 0 : index
    %36 = vector.load %arg3[%c3_25, %c0_26, %c0_27] : memref<5x32x32xf32, #tpu.memory_space<vmem>>, vector<1x32x32xf32>
    %37 = vector.shape_cast %36 : vector<1x32x32xf32> to vector<32x32xf32>
    %cst_28 = arith.constant dense<0.000000e+00> : vector<32x1024xf32>
    %38 = tpu.matmul %37, %35, %cst_28 {dimension_numbers = #tpu.dot_dimension_numbers<[1], [0], [0], [1], [0, 0, 1, 1], [], []>} : vector<32x32xf32>, vector<32x1024xf32>, vector<32x1024xf32> -> vector<32x1024xf32>
    %c4 = arith.constant 4 : index
    %c0_29 = arith.constant 0 : index
    %c0_30 = arith.constant 0 : index
    %39 = vector.load %arg4[%c4, %c0_29, %c0_30] : memref<6x32x1xf32, #tpu.memory_space<vmem>>, vector<1x32x1xf32>
    %40 = vector.shape_cast %39 : vector<1x32x1xf32> to vector<32x1xf32>
    %41 = vector.broadcast %40 : vector<32x1xf32> to vector<32x1024xf32>
    %42 = arith.addf %38, %41 : vector<32x1024xf32>
    %43 = math.tanh %42 : vector<32x1024xf32>
    %c4_31 = arith.constant 4 : index
    %c0_32 = arith.constant 0 : index
    %c0_33 = arith.constant 0 : index
    %44 = vector.load %arg3[%c4_31, %c0_32, %c0_33] : memref<5x32x32xf32, #tpu.memory_space<vmem>>, vector<1x32x32xf32>
    %45 = vector.shape_cast %44 : vector<1x32x32xf32> to vector<32x32xf32>
    %cst_34 = arith.constant dense<0.000000e+00> : vector<32x1024xf32>
    %46 = tpu.matmul %45, %43, %cst_34 {dimension_numbers = #tpu.dot_dimension_numbers<[1], [0], [0], [1], [0, 0, 1, 1], [], []>} : vector<32x32xf32>, vector<32x1024xf32>, vector<32x1024xf32> -> vector<32x1024xf32>
    %c5 = arith.constant 5 : index
    %c0_35 = arith.constant 0 : index
    %c0_36 = arith.constant 0 : index
    %47 = vector.load %arg4[%c5, %c0_35, %c0_36] : memref<6x32x1xf32, #tpu.memory_space<vmem>>, vector<1x32x1xf32>
    %48 = vector.shape_cast %47 : vector<1x32x1xf32> to vector<32x1xf32>
    %49 = vector.broadcast %48 : vector<32x1xf32> to vector<32x1024xf32>
    %50 = arith.addf %46, %49 : vector<32x1024xf32>
    %51 = math.tanh %50 : vector<32x1024xf32>
    %52 = arith.addf %51, %35 : vector<32x1024xf32>
    %c0_37 = arith.constant 0 : index
    %c0_38 = arith.constant 0 : index
    %53 = vector.load %arg5[%c0_37, %c0_38] : memref<1x32xf32, #tpu.memory_space<vmem>>, vector<1x32xf32>
    %cst_39 = arith.constant dense<0.000000e+00> : vector<1x1024xf32>
    %54 = tpu.matmul %53, %52, %cst_39 {dimension_numbers = #tpu.dot_dimension_numbers<[1], [0], [0], [1], [0, 0, 1, 1], [], []>} : vector<1x32xf32>, vector<32x1024xf32>, vector<1x1024xf32> -> vector<1x1024xf32>
    %c0_40 = arith.constant 0 : index
    %c0_41 = arith.constant 0 : index
    %55 = vector.load %arg6[%c0_40, %c0_41] : memref<1x1024xf32, #tpu.memory_space<vmem>>, vector<1x1024xf32>
    tpu.vector_store %arg6[%c0_40, %c0_41], %54 {strides = array<i32>} : memref<1x1024xf32, #tpu.memory_space<vmem>>, vector<1x1024xf32>,
    return
  }
  func.func @transform_0(%arg0: i32) -> (i32, i32) {
    %c0_i32 = arith.constant 0 : i32
    %c0_i32_0 = arith.constant 0 : i32
    return %c0_i32, %arg0 : i32, i32
  }
  func.func @transform_1(%arg0: i32) -> (i32, i32) {
    %c0_i32 = arith.constant 0 : i32
    %c0_i32_0 = arith.constant 0 : i32
    %c0_i32_1 = arith.constant 0 : i32
    return %c0_i32, %c0_i32_0 : i32, i32
  }
  func.func @transform_2(%arg0: i32) -> (i32, i32, i32) {
    %c0_i32 = arith.constant 0 : i32
    %c0_i32_0 = arith.constant 0 : i32
    %c0_i32_1 = arith.constant 0 : i32
    %c0_i32_2 = arith.constant 0 : i32
    return %c0_i32, %c0_i32_0, %c0_i32_1 : i32, i32, i32
  }
  func.func @transform_3(%arg0: i32) -> (i32, i32, i32) {
    %c0_i32 = arith.constant 0 : i32
    %c0_i32_0 = arith.constant 0 : i32
    %c0_i32_1 = arith.constant 0 : i32
    %c0_i32_2 = arith.constant 0 : i32
    return %c0_i32, %c0_i32_0, %c0_i32_1 : i32, i32, i32
  }
  func.func @transform_4(%arg0: i32) -> (i32, i32) {
    %c0_i32 = arith.constant 0 : i32
    %c0_i32_0 = arith.constant 0 : i32
    %c0_i32_1 = arith.constant 0 : i32
    return %c0_i32, %c0_i32_0 : i32, i32
  }
  func.func @transform_5(%arg0: i32) -> (i32, i32) {
    %c0_i32 = arith.constant 0 : i32
    %c0_i32_0 = arith.constant 0 : i32
    return %c0_i32, %arg0 : i32, i32
  }
}

</mosaic_0001>

<bundles_post_ra>
// kernel: resnet_tanh_forward.1
= control target key start
LH: loop header
LB: loop body
LE: loop exit
PB: predicated region body
PF: predicated region fallthrough
CT: control target
= control target key end

     0   :  { %vm57_vm0 = vcmask 64512   ;;  %v3807_v5 = vmov 0.0   ;;  %v3808_v14 = vmov 0   ;;  %s4758_s0 = inlined_call_operand.vmem [shape: f32[8,1024], index: 0, kind: input, shape index: {}]   ;;  %s4759_s1 = inlined_call_operand.vmem [shape: f32[32,8], index: 1, kind: input, shape index: {}]   ;;  %s4760_s2 = inlined_call_operand.vmem [shape: f32[5,32,32], index: 2, kind: input, shape index: {}]   ;;  %s4761_s3 = inlined_call_operand.vmem [shape: f32[6,32,1], index: 3, kind: input, shape index: {}]   ;;  %s4762_s4 = inlined_call_operand.vmem [shape: f32[1,32], index: 4, kind: input, shape index: {}]   ;;  %s4763_s5 = inlined_call_operand.hbm [shape: f32[1,1024], index: 5, kind: output, shape index: {}]  }
   0x1   :  { %v3844_v0 = vld [vmem:[%s4758_s0 + $0x8] sm:$0xff]  ;;  %v3849_v1 = vld [vmem:[%s4758_s0 + $0x18] sm:$0xff]  ;;  %v3854_v2 = vld [vmem:[%s4758_s0] sm:$0xff]  ;;  %134 = vmatprep.mubr.f32.mxu0 %v3807_v5  ;;  %223 = vmatprep.mubr.f32.mxu1 %v3807_v5 }
   0x2   :  { %70 = vmatprep.subr.mxu0 %v3844_v0  ;;  %159 = vmatprep.subr.mxu1 %v3849_v1  ;;  %v3861_v3 = vld [vmem:[%s4758_s0 + $0x10] sm:$0xff]  ;;  %v29_v4 = vld [vmem:[%s4759_s1] sm:$0xff]  ;;  %v3873_v6 = vld [vmem:[%s4758_s0 + $0x28] sm:$0xff] }
   0x3   :  { %71 = vmatpush1.msra.mxu0 %v3854_v2  ;;  %160 = vmatpush1.msra.mxu1 %v3861_v3  ;;  %v3878_v7 = vld [vmem:[%s4758_s0 + $0x38] sm:$0xff]  ;;  %v3885_v8 = vld [vmem:[%s4758_s0 + $0x20] sm:$0xff]  ;;  %v3890_v9 = vld [vmem:[%s4758_s0 + $0x30] sm:$0xff] }
   0x4   :  { %3065 = vmatmul.mubr.msk.f32.vlgmr.msra.gmra.mrb[0].mxu0 %vm57_vm0, %v29_v4  ;;  %3069 = vmatmul.mubr.msk.f32.vlgmr.msra.gmra.mrb[0].mxu1 %vm57_vm0, %v29_v4  ;;  %v30_v10 = vld [vmem:[%s4759_s1 + $0x8] sm:$0xff]  ;;  %v33_v11 = vld [vmem:[%s4761_s3] sm:$0xff]  ;;  %v35_v12 = vld [vmem:[%s4761_s3 + $0x10] sm:$0xff] }
   0x5   :  { %140 = vmatprep.mubr.f32.mxu0 %v3807_v5  ;;  %229 = vmatprep.mubr.f32.mxu1 %v3807_v5  ;;  %v31_v13 = vld [vmem:[%s4759_s1 + $0x10] sm:$0xff]  ;;  %v34_v15 = vld [vmem:[%s4761_s3 + $0x8] sm:$0xff]  ;;  %v36_v16 = vld [vmem:[%s4761_s3 + $0x18] sm:$0xff] }
   0x6   :  { %248 = vmatprep.subr.mxu0 %v3873_v6  ;;  %337 = vmatprep.subr.mxu1 %v3878_v7 }
   0x7   :  { %249 = vmatpush1.msra.mxu0 %v3885_v8  ;;  %338 = vmatpush1.msra.mxu1 %v3890_v9 }
   0x8   :  { %3066 = vmatmul.mubr.msk.f32.gmra.mrb[2].mxu0 %vm57_vm0, %v30_v10  ;;  %3070 = vmatmul.mubr.msk.f32.gmra.mrb[2].mxu1 %vm57_vm0, %v30_v10 }
   0x9   :  { %146 = vmatprep.mubr.f32.mxu0 %v3807_v5  ;;  %235 = vmatprep.mubr.f32.mxu1 %v3807_v5 }
   0xa   :  { %3397 = vset.pattern.permute.xlu0 %v3808_v14  ;;  %3398 = vset.pattern.permute.xlu1 %v3808_v14 }
   0xb   :  { %39 = vperm.xlu0 %3397, %v33_v11   ;;  %49 = vperm.xlu1 %3398, %v35_v12  }
   0xc   :  { %3067 = vmatmul.mubr.msk.f32.gmra.mrb[4].mxu0 %vm57_vm0, %v31_v13  ;;  %3071 = vmatmul.mubr.msk.f32.gmra.mrb[4].mxu1 %vm57_vm0, %v31_v13 }
   0xd   :  { %10 = vsyncpa [#allocation3], 0  ;;  %152 = vmatprep.mubr.f32.mxu0 %v3807_v5  ;;  %241 = vmatprep.mubr.f32.mxu1 %v3807_v5  ;;  %v32_v17 = vld [vmem:[%s4759_s1 + $0x18] sm:$0xff]  ;;  %v3081_v18 = vld [vmem:[%s4761_s3 + $0x20] sm:$0xff]  ;;  %vm487_vm1 = vcmask 261120  }
   0xe   :  { %v3082_v19 = vld [vmem:[%s4761_s3 + $0x28] sm:$0xff]  ;;  %v3083_v20 = vld [vmem:[%s4761_s3 + $0x30] sm:$0xff]  ;;  %v3084_v21 = vld [vmem:[%s4761_s3 + $0x38] sm:$0xff] }
   0xf   :  { %44 = vperm.xlu0 %3397, %v34_v15   ;;  %54 = vperm.xlu1 %3398, %v36_v16   ;;  %v3105_v22 = vld [vmem:[%s4761_s3 + $0x40] sm:$0xff]  ;;  %v3106_v23 = vld [vmem:[%s4761_s3 + $0x48] sm:$0xff]  ;;  %v3107_v24 = vld [vmem:[%s4761_s3 + $0x50] sm:$0xff] }
  0x10   :  { %3068 = vmatmul.mubr.msk.f32.gmra.mrb[6].mxu0 %vm57_vm0, %v32_v17  ;;  %3072 = vmatmul.mubr.msk.f32.gmra.mrb[6].mxu1 %vm57_vm0, %v32_v17  ;;  %v3108_v25 = vld [vmem:[%s4761_s3 + $0x58] sm:$0xff]  ;;  %v3129_v26 = vld [vmem:[%s4761_s3 + $0x60] sm:$0xff]  ;;  %v3130_v27 = vld [vmem:[%s4761_s3 + $0x68] sm:$0xff] }
  0x11   :  { %312 = vmatprep.mubr.f32.mxu0 %v3807_v5  ;;  %401 = vmatprep.mubr.f32.mxu1 %v3807_v5  ;;  %v3131_v28 = vld [vmem:[%s4761_s3 + $0x70] sm:$0xff]  ;;  %v3132_v29 = vld [vmem:[%s4761_s3 + $0x78] sm:$0xff]  ;;  %v3153_v30 = vld [vmem:[%s4761_s3 + $0x80] sm:$0xff] }
  0x12   :  { %v3154_v31 = vld [vmem:[%s4761_s3 + $0x88] sm:$0xff]  ;;  %v3155_v32 = vld [vmem:[%s4761_s3 + $0x90] sm:$0xff]  ;;  %v3156_v33 = vld [vmem:[%s4761_s3 + $0x98] sm:$0xff] }
  0x13   :  { %469 = vperm.xlu0 %3397, %v3081_v18   ;;  %474 = vperm.xlu1 %3398, %v3082_v19   ;;  %v3177_v34 = vld [vmem:[%s4761_s3 + $0xa0] sm:$0xff]  ;;  %v3178_v35 = vld [vmem:[%s4761_s3 + $0xa8] sm:$0xff]  ;;  %v3179_v36 = vld [vmem:[%s4761_s3 + $0xb0] sm:$0xff] }
  0x14   :  { %3073 = vmatmul.mubr.msk.f32.vlgmr.msra.gmra.mrb[8].mxu0 %vm57_vm0, %v29_v4  ;;  %3077 = vmatmul.mubr.msk.f32.vlgmr.msra.gmra.mrb[8].mxu1 %vm57_vm0, %v29_v4  ;;  %v3180_v37 = vld [vmem:[%s4761_s3 + $0xb8] sm:$0xff] }
  0x15   :  { %318 = vmatprep.mubr.f32.mxu0 %v3807_v5  ;;  %407 = vmatprep.mubr.f32.mxu1 %v3807_v5 }
  0x17   :  { %479 = vperm.xlu0 %3397, %v3083_v20   ;;  %484 = vperm.xlu1 %3398, %v3084_v21  }
  0x18   :  { %3074 = vmatmul.mubr.msk.f32.gmra.mrb[10].mxu0 %vm57_vm0, %v30_v10  ;;  %3078 = vmatmul.mubr.msk.f32.gmra.mrb[10].mxu1 %vm57_vm0, %v30_v10 }
  0x19   :  { %324 = vmatprep.mubr.f32.mxu0 %v3807_v5  ;;  %413 = vmatprep.mubr.f32.mxu1 %v3807_v5 }
  0x1b   :  { %932 = vperm.xlu0 %3397, %v3105_v22   ;;  %937 = vperm.xlu1 %3398, %v3106_v23  }
  0x1c   :  { %3075 = vmatmul.mubr.msk.f32.gmra.mrb[12].mxu0 %vm57_vm0, %v31_v13  ;;  %3079 = vmatmul.mubr.msk.f32.gmra.mrb[12].mxu1 %vm57_vm0, %v31_v13 }
  0x1d   :  { %330 = vmatprep.mubr.f32.mxu0 %v3807_v5  ;;  %419 = vmatprep.mubr.f32.mxu1 %v3807_v5 }
  0x1f   :  { %942 = vperm.xlu0 %3397, %v3107_v24   ;;  %947 = vperm.xlu1 %3398, %v3108_v25  }
  0x20   :  { %3076 = vmatmul.mubr.msk.f32.gmra.mrb[14].mxu0 %vm57_vm0, %v32_v17  ;;  %3080 = vmatmul.mubr.msk.f32.gmra.mrb[14].mxu1 %vm57_vm0, %v32_v17 }
  0x21   :  { %564 = vmatprep.mubr.f32.mxu0 %v3807_v5  ;;  %653 = vmatprep.mubr.f32.mxu1 %v3807_v5 }
  0x23   :  { %1362 = vperm.xlu0 %3397, %v3129_v26   ;;  %1367 = vperm.xlu1 %3398, %v3130_v27  }
  0x27   :  { %1372 = vperm.xlu0 %3397, %v3131_v28   ;;  %1377 = vperm.xlu1 %3398, %v3132_v29  }
  0x2b   :  { %1824 = vperm.xlu0 %3397, %v3153_v30   ;;  %1829 = vperm.xlu1 %3398, %v3154_v31  }
  0x2f   :  { %1834 = vperm.xlu0 %3397, %v3155_v32   ;;  %1839 = vperm.xlu1 %3398, %v3156_v33  }
  0x33   :  { %2254 = vperm.xlu0 %3397, %v3177_v34   ;;  %2259 = vperm.xlu1 %3398, %v3178_v35  }
  0x37   :  { %2264 = vperm.xlu0 %3397, %v3179_v36   ;;  %2269 = vperm.xlu1 %3398, %v3180_v37  }
  0x8a   :  { %v4007_v38 = vpop.permute.xlu0 %39  ;;  %v4015_v48 = vpop.permute.xlu1 %49 }
  0x8e   :  { %v4013_v47 = vpop.permute.xlu0 %44  ;;  %v4025_v10 = vpop.permute.xlu1 %54 }
  0xd7   :  { %v136_v39 = vpop.f32.mrb[0].mxu0  ;;  %v225_v40 = vpop.f32.mrb[0].mxu1 }
  0xd8   :  { %v137_v41 = vadd.f32 %v136_v39, %v4007_v38  ;;  %v226_v42 = vadd.f32 %v225_v40, %v4007_v38  ;;  %v138_v43 = vpop.f32.mrb[1].mxu0  ;;  %v227_v44 = vpop.f32.mrb[1].mxu1 }
  0xd9   :  { %v139_v45 = vadd.f32 %v138_v43, %v4007_v38  ;;  %v228_v46 = vadd.f32 %v227_v44, %v4007_v38 }
  0xda   :  { %3399 = vtanh.f32 %v137_v41 }
  0xdb   :  { %3401 = vtanh.f32 %v226_v42  ;;  %v142_v49 = vpop.f32.mrb[2].mxu0  ;;  %v231_v50 = vpop.f32.mrb[2].mxu1 }
  0xdc   :  { %3403 = vtanh.f32 %v139_v45  ;;  %v143_v51 = vadd.f32 %v142_v49, %v4013_v47  ;;  %v232_v52 = vadd.f32 %v231_v50, %v4013_v47  ;;  %v144_v53 = vpop.f32.mrb[3].mxu0  ;;  %v233_v54 = vpop.f32.mrb[3].mxu1 }
  0xdd   :  { %3405 = vtanh.f32 %v228_v46  ;;  %v145_v55 = vadd.f32 %v144_v53, %v4013_v47  ;;  %v234_v56 = vadd.f32 %v233_v54, %v4013_v47 }
  0xde   :  { %3407 = vtanh.f32 %v143_v51 }
  0xdf   :  { %3409 = vtanh.f32 %v232_v52  ;;  %v148_v57 = vpop.f32.mrb[4].mxu0  ;;  %v237_v58 = vpop.f32.mrb[4].mxu1 }
  0xe0   :  { %3411 = vtanh.f32 %v145_v55  ;;  %v149_v59 = vadd.f32 %v148_v57, %v4015_v48  ;;  %v238_v60 = vadd.f32 %v237_v58, %v4015_v48  ;;  %v150_v61 = vpop.f32.mrb[5].mxu0  ;;  %v239_v62 = vpop.f32.mrb[5].mxu1 }
  0xe1   :  { %3413 = vtanh.f32 %v234_v56  ;;  %v151_v63 = vadd.f32 %v150_v61, %v4015_v48  ;;  %v240_v4 = vadd.f32 %v239_v62, %v4015_v48 }
  0xe2   :  { %3415 = vtanh.f32 %v149_v59 }
  0xe3   :  { %3417 = vtanh.f32 %v238_v60  ;;  %v154_v11 = vpop.f32.mrb[6].mxu0  ;;  %v243_v12 = vpop.f32.mrb[6].mxu1 }
  0xe4   :  { %v3400_v13 = vpop.eup %3399  ;;  %3419 = vtanh.f32 %v151_v63  ;;  %v155_v14 = vadd.f32 %v154_v11, %v4025_v10  ;;  %v244_v15 = vadd.f32 %v243_v12, %v4025_v10  ;;  %v156_v16 = vpop.f32.mrb[7].mxu0 }
  0xe5   :  { %v245_v17 = vpop.f32.mrb[7].mxu1  ;;  %v3402_v18 = vpop.eup %3401  ;;  %3421 = vtanh.f32 %v240_v4  ;;  %v157_v19 = vadd.f32 %v156_v16, %v4025_v10 }
  0xe6   :  { %v246_v20 = vadd.f32 %v245_v17, %v4025_v10  ;;  %v3404_v21 = vpop.eup %3403  ;;  %3423 = vtanh.f32 %v155_v14 }
  0xe7   :  { %v3406_v22 = vpop.eup %3405  ;;  %3425 = vtanh.f32 %v244_v15  ;;  %v314_v23 = vpop.f32.mrb[8].mxu0 }
  0xe8   :  { %v403_v24 = vpop.f32.mrb[8].mxu1  ;;  %v3408_v25 = vpop.eup %3407  ;;  %3427 = vtanh.f32 %v157_v19  ;;  %v315_v26 = vadd.f32 %v314_v23, %v4007_v38 }
  0xe9   :  { %v404_v27 = vadd.f32 %v403_v24, %v4007_v38  ;;  %v316_v28 = vpop.f32.mrb[9].mxu0  ;;  %v405_v29 = vpop.f32.mrb[9].mxu1  ;;  %3429 = vtanh.f32 %v246_v20  ;;  %v3203_v33 = vpack.c.bf16 %v3408_v25, %v3400_v13  ;;  %v458_v24 = vld [vmem:[%s4760_s2] sm:$0xff] }
  0xea   :  { %v3410_v30 = vpop.eup %3409  ;;  %v317_v31 = vadd.f32 %v316_v28, %v4007_v38  ;;  %v406_v32 = vadd.f32 %v405_v29, %v4007_v38  ;;  %3431 = vtanh.f32 %v315_v26  ;;  %v459_v29 = vld [vmem:[%s4760_s2 + $0x8] sm:$0xff] }
  0xeb   :  { %v3412_v34 = vpop.eup %3411  ;;  %v3211_v35 = vpack.c.bf16 %v3410_v30, %v3402_v18  ;;  %3433 = vtanh.f32 %v404_v27  ;;  %v320_v37 = vpop.f32.mrb[10].mxu0 }
  0xec   :  { %v3414_v36 = vpop.eup %3413  ;;  %v409_v39 = vpop.f32.mrb[10].mxu1  ;;  %v3201_v40 = vpack.c.bf16 %v3412_v34, %v3404_v21  ;;  %3435 = vtanh.f32 %v317_v31  ;;  %v321_v42 = vadd.f32 %v320_v37, %v4013_v47  ;;  %v460_v37 = vld [vmem:[%s4760_s2 + $0x10] sm:$0xff] }
  0xed   :  { %v3416_v41 = vpop.eup %3415  ;;  %v410_v43 = vadd.f32 %v409_v39, %v4013_v47  ;;  %v322_v44 = vpop.f32.mrb[11].mxu0  ;;  %v3209_v46 = vpack.c.bf16 %v3414_v36, %v3406_v22  ;;  %3437 = vtanh.f32 %v406_v32 }
  0xee   :  { %v411_v45 = vpop.f32.mrb[11].mxu1  ;;  %v3418_v49 = vpop.eup %3417  ;;  %v323_v38 = vadd.f32 %v322_v44, %v4013_v47  ;;  %3202 = vmatprep.subr.bf16.mxu0 %v3201_v40  ;;  %3439 = vtanh.f32 %v321_v42  ;;  %v461_v44 = vld [vmem:[%s4760_s2 + $0x18] sm:$0xff] }
  0xef   :  { %v412_v50 = vadd.f32 %v411_v45, %v4013_v47  ;;  %v3420_v51 = vpop.eup %3419  ;;  %3210 = vmatprep.subr.bf16.mxu1 %v3209_v46  ;;  %3204 = vmatpush1.bf16.msra.mxu0 %v3203_v33  ;;  %3441 = vtanh.f32 %v410_v43  ;;  %v326_v53 = vpop.f32.mrb[12].mxu0 }
  0xf0   :  { %v3422_v52 = vpop.eup %3421  ;;  %3212 = vmatpush1.bf16.msra.mxu1 %v3211_v35  ;;  %v415_v54 = vpop.f32.mrb[12].mxu1  ;;  %3443 = vtanh.f32 %v323_v38  ;;  %v327_v56 = vadd.f32 %v326_v53, %v4015_v48 }
  0xf1   :  { %v3424_v55 = vpop.eup %3423  ;;  %v416_v57 = vadd.f32 %v415_v54, %v4015_v48  ;;  %v328_v58 = vpop.f32.mrb[13].mxu0  ;;  %3445 = vtanh.f32 %v412_v50 }
  0xf2   :  { %v417_v59 = vpop.f32.mrb[13].mxu1  ;;  %v3426_v60 = vpop.eup %3425  ;;  %v329_v47 = vadd.f32 %v328_v58, %v4015_v48  ;;  %v3207_v62 = vpack.c.bf16 %v3424_v55, %v3416_v41  ;;  %3447 = vtanh.f32 %v327_v56 }
  0xf3   :  { %v418_v61 = vadd.f32 %v417_v59, %v4015_v48  ;;  %v3428_v63 = vpop.eup %3427  ;;  %v3215_v4 = vpack.c.bf16 %v3426_v60, %v3418_v49  ;;  %3449 = vtanh.f32 %v416_v57  ;;  %v332_v12 = vpop.f32.mrb[14].mxu0 }
  0xf4   :  { %v3430_v11 = vpop.eup %3429  ;;  %v421_v13 = vpop.f32.mrb[14].mxu1  ;;  %v3205_v14 = vpack.c.bf16 %v3428_v63, %v3420_v51  ;;  %3451 = vtanh.f32 %v329_v47  ;;  %v333_v16 = vadd.f32 %v332_v12, %v4025_v10 }
  0xf5   :  { %v3432_v15 = vpop.eup %3431  ;;  %v422_v17 = vadd.f32 %v421_v13, %v4025_v10  ;;  %v334_v18 = vpop.f32.mrb[15].mxu0  ;;  %v3213_v20 = vpack.c.bf16 %v3430_v11, %v3422_v52  ;;  %3453 = vtanh.f32 %v418_v61 }
  0xf6   :  { %v423_v19 = vpop.f32.mrb[15].mxu1  ;;  %v3434_v21 = vpop.eup %3433  ;;  %v335_v48 = vadd.f32 %v334_v18, %v4025_v10  ;;  %3206 = vmatprep.subr.bf16.mxu0 %v3205_v14  ;;  %3455 = vtanh.f32 %v333_v16 }
  0xf7   :  { %v424_v22 = vadd.f32 %v423_v19, %v4025_v10  ;;  %v3436_v23 = vpop.eup %3435  ;;  %3214 = vmatprep.subr.bf16.mxu1 %v3213_v20  ;;  %3208 = vmatpush1.bf16.msra.mxu0 %v3207_v62  ;;  %3457 = vtanh.f32 %v422_v17  ;;  %v4091_v50 = vpop.permute.xlu0 %469 }
  0xf8   :  { %v3438_v25 = vpop.eup %3437  ;;  %3216 = vmatpush1.bf16.msra.mxu1 %v3215_v4  ;;  %3459 = vtanh.f32 %v335_v48  ;;  %v4097_v59 = vpop.permute.xlu1 %474 }
  0xf9   :  { %v3440_v26 = vpop.eup %3439  ;;  %3461 = vtanh.f32 %v424_v22 }
  0xfa   :  { %v3442_v27 = vpop.eup %3441  ;;  %3085 = vmatmul.mubr.msk.f32.vlgmr.msra.gmra.mrb[16].mxu0 %vm487_vm1, %v458_v24  ;;  %v3219_v10 = vpack.c.bf16 %v3440_v26, %v3432_v15 }
  0xfb   :  { %v3444_v28 = vpop.eup %3443  ;;  %3089 = vmatmul.mubr.msk.f32.vlgmr.msra.gmra.mrb[16].mxu1 %vm487_vm1, %v458_v24  ;;  %570 = vmatprep.mubr.f32.mxu0 %v3807_v5  ;;  %v3227_v30 = vpack.c.bf16 %v3442_v27, %v3434_v21  ;;  %v4103_v13 = vpop.permute.xlu0 %479 }
  0xfc   :  { %v3446_v31 = vpop.eup %3445  ;;  %659 = vmatprep.mubr.f32.mxu1 %v3807_v5  ;;  %v3217_v32 = vpack.c.bf16 %v3444_v28, %v3436_v23  ;;  %v4109_v48 = vpop.permute.xlu1 %484 }
  0xfd   :  { %v3448_v33 = vpop.eup %3447  ;;  %v3225_v34 = vpack.c.bf16 %v3446_v31, %v3438_v25 }
  0xfe   :  { %v3450_v35 = vpop.eup %3449  ;;  %3086 = vmatmul.mubr.msk.f32.gmra.mrb[18].mxu0 %vm487_vm1, %v459_v29  ;;  %3218 = vmatprep.subr.bf16.mxu0 %v3217_v32 }
  0xff   :  { %v3452_v36 = vpop.eup %3451  ;;  %3090 = vmatmul.mubr.msk.f32.gmra.mrb[18].mxu1 %vm487_vm1, %v459_v29  ;;  %3226 = vmatprep.subr.bf16.mxu1 %v3225_v34 }
 0x100   :  { %v3454_v39 = vpop.eup %3453  ;;  %3220 = vmatpush1.bf16.msra.mxu0 %v3219_v10  ;;  %3228 = vmatpush1.bf16.msra.mxu1 %v3227_v30 }
 0x101   :  { %v3456_v40 = vpop.eup %3455  ;;  %576 = vmatprep.mubr.f32.mxu0 %v3807_v5  ;;  %665 = vmatprep.mubr.f32.mxu1 %v3807_v5 }
 0x102   :  { %v3458_v41 = vpop.eup %3457  ;;  %3087 = vmatmul.mubr.msk.f32.gmra.mrb[20].mxu0 %vm487_vm1, %v460_v37  ;;  %v3223_v42 = vpack.c.bf16 %v3456_v40, %v3448_v33 }
 0x103   :  { %v3460_v43 = vpop.eup %3459  ;;  %3091 = vmatmul.mubr.msk.f32.gmra.mrb[20].mxu1 %vm487_vm1, %v460_v37  ;;  %582 = vmatprep.mubr.f32.mxu0 %v3807_v5  ;;  %v3231_v45 = vpack.c.bf16 %v3458_v41, %v3450_v35 }
 0x104   :  { %v3462_v46 = vpop.eup %3461  ;;  %671 = vmatprep.mubr.f32.mxu1 %v3807_v5  ;;  %v3221_v49 = vpack.c.bf16 %v3460_v43, %v3452_v36 }
 0x105   :  { %v3229_v38 = vpack.c.bf16 %v3462_v46, %v3454_v39 }
 0x106   :  { %3088 = vmatmul.mubr.msk.f32.gmra.mrb[22].mxu0 %vm487_vm1, %v461_v44  ;;  %3222 = vmatprep.subr.bf16.mxu0 %v3221_v49 }
 0x107   :  { %3092 = vmatmul.mubr.msk.f32.gmra.mrb[22].mxu1 %vm487_vm1, %v461_v44  ;;  %3230 = vmatprep.subr.bf16.mxu1 %v3229_v38 }
 0x108   :  { %3224 = vmatpush1.bf16.msra.mxu0 %v3223_v42  ;;  %3232 = vmatpush1.bf16.msra.mxu1 %v3231_v45 }
 0x109   :  { %742 = vmatprep.mubr.f32.mxu0 %v3807_v5  ;;  %831 = vmatprep.mubr.f32.mxu1 %v3807_v5 }
 0x10b   :  { %3093 = vmatmul.mubr.msk.f32.vlgmr.msra.gmra.mrb[24].mxu0 %vm487_vm1, %v458_v24  ;;  %3097 = vmatmul.mubr.msk.f32.vlgmr.msra.gmra.mrb[24].mxu1 %vm487_vm1, %v458_v24 }
 0x10c   :  { %748 = vmatprep.mubr.f32.mxu0 %v3807_v5  ;;  %837 = vmatprep.mubr.f32.mxu1 %v3807_v5 }
 0x10f   :  { %3094 = vmatmul.mubr.msk.f32.gmra.mrb[26].mxu0 %vm487_vm1, %v459_v29  ;;  %3098 = vmatmul.mubr.msk.f32.gmra.mrb[26].mxu1 %vm487_vm1, %v459_v29 }
 0x110   :  { %754 = vmatprep.mubr.f32.mxu0 %v3807_v5  ;;  %843 = vmatprep.mubr.f32.mxu1 %v3807_v5 }
 0x113   :  { %3095 = vmatmul.mubr.msk.f32.gmra.mrb[28].mxu0 %vm487_vm1, %v460_v37  ;;  %3099 = vmatmul.mubr.msk.f32.gmra.mrb[28].mxu1 %vm487_vm1, %v460_v37 }
 0x114   :  { %760 = vmatprep.mubr.f32.mxu0 %v3807_v5  ;;  %849 = vmatprep.mubr.f32.mxu1 %v3807_v5 }
 0x117   :  { %3096 = vmatmul.mubr.msk.f32.gmra.mrb[30].mxu0 %vm487_vm1, %v461_v44  ;;  %3100 = vmatmul.mubr.msk.f32.gmra.mrb[30].mxu1 %vm487_vm1, %v461_v44 }
 0x118   :  { %1026 = vmatprep.mubr.f32.mxu0 %v3807_v5  ;;  %1115 = vmatprep.mubr.f32.mxu1 %v3807_v5 }
 0x1cd   :  { %v566_v51 = vpop.f32.mrb[16].mxu0 }
 0x1ce   :  { %v567_v52 = vadd.f32 %v566_v51, %v4091_v50  ;;  %v655_v53 = vpop.f32.mrb[16].mxu1  ;;  %v568_v54 = vpop.f32.mrb[17].mxu0 }
 0x1cf   :  { %v656_v55 = vadd.f32 %v655_v53, %v4091_v50  ;;  %v569_v56 = vadd.f32 %v568_v54, %v4091_v50  ;;  %v657_v57 = vpop.f32.mrb[17].mxu1 }
 0x1d0   :  { %3463 = vtanh.f32 %v567_v52  ;;  %v658_v58 = vadd.f32 %v657_v57, %v4091_v50 }
 0x1d1   :  { %3465 = vtanh.f32 %v656_v55  ;;  %v572_v60 = vpop.f32.mrb[18].mxu0 }
 0x1d2   :  { %3467 = vtanh.f32 %v569_v56  ;;  %v573_v47 = vadd.f32 %v572_v60, %v4097_v59  ;;  %v661_v61 = vpop.f32.mrb[18].mxu1  ;;  %v574_v62 = vpop.f32.mrb[19].mxu0 }
 0x1d3   :  { %3469 = vtanh.f32 %v658_v58  ;;  %v662_v63 = vadd.f32 %v661_v61, %v4097_v59  ;;  %v575_v4 = vadd.f32 %v574_v62, %v4097_v59  ;;  %v663_v11 = vpop.f32.mrb[19].mxu1 }
 0x1d4   :  { %3471 = vtanh.f32 %v573_v47  ;;  %v664_v12 = vadd.f32 %v663_v11, %v4097_v59 }
 0x1d5   :  { %3473 = vtanh.f32 %v662_v63  ;;  %v578_v14 = vpop.f32.mrb[20].mxu0 }
 0x1d6   :  { %3475 = vtanh.f32 %v575_v4  ;;  %v579_v15 = vadd.f32 %v578_v14, %v4103_v13  ;;  %v667_v16 = vpop.f32.mrb[20].mxu1  ;;  %v580_v17 = vpop.f32.mrb[21].mxu0 }
 0x1d7   :  { %3477 = vtanh.f32 %v664_v12  ;;  %v668_v18 = vadd.f32 %v667_v16, %v4103_v13  ;;  %v581_v19 = vadd.f32 %v580_v17, %v4103_v13  ;;  %v669_v20 = vpop.f32.mrb[21].mxu1 }
 0x1d8   :  { %3479 = vtanh.f32 %v579_v15  ;;  %v670_v21 = vadd.f32 %v669_v20, %v4103_v13 }
 0x1d9   :  { %3481 = vtanh.f32 %v668_v18  ;;  %v584_v22 = vpop.f32.mrb[22].mxu0 }
 0x1da   :  { %v3464_v23 = vpop.eup %3463  ;;  %3483 = vtanh.f32 %v581_v19  ;;  %v585_v24 = vadd.f32 %v584_v22, %v4109_v48  ;;  %v673_v25 = vpop.f32.mrb[22].mxu1 }
 0x1db   :  { %v586_v26 = vpop.f32.mrb[23].mxu0  ;;  %v3466_v27 = vpop.eup %3465  ;;  %3485 = vtanh.f32 %v670_v21  ;;  %v674_v10 = vadd.f32 %v673_v25, %v4109_v48  ;;  %v4132_v49 = vadd.f32 %v3464_v23, %v3854_v2 }
 0x1dc   :  { %v587_v28 = vadd.f32 %v586_v26, %v4109_v48  ;;  %v675_v29 = vpop.f32.mrb[23].mxu1  ;;  %v3468_v30 = vpop.eup %3467  ;;  %3487 = vtanh.f32 %v585_v24 }
 0x1dd   :  { %v676_v31 = vadd.f32 %v675_v29, %v4109_v48  ;;  %v3470_v32 = vpop.eup %3469  ;;  %3489 = vtanh.f32 %v674_v10  ;;  %v4122_v42 = vadd.f32 %v3468_v30, %v3844_v0  ;;  %v4139_v0 = vadd.f32 %v3466_v27, %v3861_v3 }
 0x1de   :  { %v4115_v33 = vpop.eup %3471  ;;  %3491 = vtanh.f32 %v587_v28  ;;  %v744_v34 = vpop.f32.mrb[24].mxu0  ;;  %v4129_v46 = vadd.f32 %v3470_v32, %v3849_v1 }
 0x1df   :  { %v833_v35 = vpop.f32.mrb[24].mxu1  ;;  %v4117_v36 = vpop.eup %3473  ;;  %3493 = vtanh.f32 %v676_v31  ;;  %v745_v37 = vadd.f32 %v744_v34, %v4091_v50  ;;  %v3235_v2 = vpack.c.bf16 %v4115_v33, %v4132_v49  ;;  %v3101_v34 = vld [vmem:[%s4760_s2 + $0x20] sm:$0xff] }
 0x1e0   :  { %v834_v39 = vadd.f32 %v833_v35, %v4091_v50  ;;  %v746_v40 = vpop.f32.mrb[25].mxu0  ;;  %v835_v41 = vpop.f32.mrb[25].mxu1  ;;  %v3243_v58 = vpack.c.bf16 %v4117_v36, %v4139_v0 }
 0x1e1   :  { %v4124_v43 = vpop.eup %3475  ;;  %v747_v44 = vadd.f32 %v746_v40, %v4091_v50  ;;  %v836_v45 = vadd.f32 %v835_v41, %v4091_v50  ;;  %3495 = vtanh.f32 %v745_v37 }
 0x1e2   :  { %v4134_v38 = vpop.eup %3477  ;;  %v3233_v51 = vpack.c.bf16 %v4124_v43, %v4122_v42  ;;  %3497 = vtanh.f32 %v834_v39  ;;  %v750_v53 = vpop.f32.mrb[26].mxu0 }
 0x1e3   :  { %v4141_v52 = vpop.eup %3479  ;;  %v839_v50 = vpop.f32.mrb[26].mxu1  ;;  %v3241_v1 = vpack.c.bf16 %v4134_v38, %v4129_v46  ;;  %3499 = vtanh.f32 %v747_v44  ;;  %v751_v55 = vadd.f32 %v750_v53, %v4097_v59 }
 0x1e4   :  { %v4147_v54 = vpop.eup %3481  ;;  %v840_v56 = vadd.f32 %v839_v50, %v4097_v59  ;;  %v752_v3 = vpop.f32.mrb[27].mxu0  ;;  %3234 = vmatprep.subr.bf16.mxu0 %v3233_v51  ;;  %3501 = vtanh.f32 %v836_v45 }
 0x1e5   :  { %v841_v57 = vpop.f32.mrb[27].mxu1  ;;  %v4153_v60 = vpop.eup %3483  ;;  %v753_v47 = vadd.f32 %v752_v3, %v4097_v59  ;;  %3242 = vmatprep.subr.bf16.mxu1 %v3241_v1  ;;  %3236 = vmatpush1.bf16.msra.mxu0 %v3235_v2  ;;  %3503 = vtanh.f32 %v751_v55 }
 0x1e6   :  { %v842_v61 = vadd.f32 %v841_v57, %v4097_v59  ;;  %v4157_v62 = vpop.eup %3485  ;;  %3244 = vmatpush1.bf16.msra.mxu1 %v3243_v58  ;;  %3505 = vtanh.f32 %v840_v56  ;;  %v756_v4 = vpop.f32.mrb[28].mxu0  ;;  %v3104_v58 = vld [vmem:[%s4760_s2 + $0x38] sm:$0xff] }
 0x1e7   :  { %v4159_v63 = vpop.eup %3487  ;;  %v845_v11 = vpop.f32.mrb[28].mxu1  ;;  %3507 = vtanh.f32 %v753_v47  ;;  %v757_v14 = vadd.f32 %v756_v4, %v4103_v13 }
 0x1e8   :  { %v4161_v12 = vpop.eup %3489  ;;  %v758_v15 = vpop.f32.mrb[29].mxu0  ;;  %3509 = vtanh.f32 %v842_v61  ;;  %v3239_v24 = vpack.c.bf16 %v4159_v63, %v4141_v52  ;;  %v846_v37 = vadd.f32 %v845_v11, %v4103_v13 }
 0x1e9   :  { %v847_v16 = vpop.f32.mrb[29].mxu1  ;;  %v4164_v17 = vpop.eup %3491  ;;  %v759_v59 = vadd.f32 %v758_v15, %v4103_v13  ;;  %3511 = vtanh.f32 %v757_v14  ;;  %v3247_v29 = vpack.c.bf16 %v4161_v12, %v4147_v54 }
 0x1ea   :  { %v848_v18 = vadd.f32 %v847_v16, %v4103_v13  ;;  %v4168_v19 = vpop.eup %3493  ;;  %v3237_v20 = vpack.c.bf16 %v4164_v17, %v4153_v60  ;;  %v762_v21 = vpop.f32.mrb[30].mxu0  ;;  %v3102_v13 = vld [vmem:[%s4760_s2 + $0x28] sm:$0xff] }
 0x1eb   :  { %v851_v22 = vpop.f32.mrb[30].mxu1  ;;  %v3245_v23 = vpack.c.bf16 %v4168_v19, %v4157_v62  ;;  %v3496_v25 = vpop.eup %3495  ;;  %3513 = vtanh.f32 %v759_v59  ;;  %v763_v26 = vadd.f32 %v762_v21, %v4109_v48 }
 0x1ec   :  { %v852_v27 = vadd.f32 %v851_v22, %v4109_v48  ;;  %v764_v10 = vpop.f32.mrb[31].mxu0  ;;  %v853_v28 = vpop.f32.mrb[31].mxu1  ;;  %3238 = vmatprep.subr.bf16.mxu0 %v3237_v20  ;;  %3515 = vtanh.f32 %v848_v18  ;;  %v4206_v51 = vadd.f32 %v3496_v25, %v3885_v8 }
 0x1ed   :  { %v3498_v30 = vpop.eup %3497  ;;  %v765_v31 = vadd.f32 %v764_v10, %v4109_v48  ;;  %v854_v32 = vadd.f32 %v853_v28, %v4109_v48  ;;  %3246 = vmatprep.subr.bf16.mxu1 %v3245_v23  ;;  %3240 = vmatpush1.bf16.msra.mxu0 %v3239_v24  ;;  %3517 = vtanh.f32 %v763_v26  ;;  %v4279_v59 = vpop.permute.xlu0 %932 }
 0x1ee   :  { %v3500_v35 = vpop.eup %3499  ;;  %3248 = vmatpush1.bf16.msra.mxu1 %v3247_v29  ;;  %3519 = vtanh.f32 %v852_v27  ;;  %v4213_v1 = vadd.f32 %v3498_v30, %v3890_v9  ;;  %v3103_v9 = vld [vmem:[%s4760_s2 + $0x30] sm:$0xff]  ;;  %v4285_v27 = vpop.permute.xlu1 %937 }
 0x1ef   :  { %v3502_v39 = vpop.eup %3501  ;;  %3521 = vtanh.f32 %v765_v31  ;;  %v4197_v48 = vadd.f32 %v3500_v35, %v3873_v6 }
 0x1f0   :  { %v4186_v40 = vpop.eup %3503  ;;  %3109 = vmatmul.mubr.msk.f32.vlgmr.msra.gmra.mrb[32].mxu0 %vm487_vm1, %v3101_v34  ;;  %3523 = vtanh.f32 %v854_v32  ;;  %v4203_v45 = vadd.f32 %v3502_v39, %v3878_v7 }
 0x1f1   :  { %v4189_v41 = vpop.eup %3505  ;;  %3113 = vmatmul.mubr.msk.f32.vlgmr.msra.gmra.mrb[32].mxu1 %vm487_vm1, %v3101_v34  ;;  %1032 = vmatprep.mubr.f32.mxu0 %v3807_v5  ;;  %3525 = vtanh.f32 %v846_v37  ;;  %v3251_v7 = vpack.c.bf16 %v4186_v40, %v4206_v51  ;;  %v4291_v37 = vpop.permute.xlu0 %942 }
 0x1f2   :  { %v4199_v44 = vpop.eup %3507  ;;  %1121 = vmatprep.mubr.f32.mxu1 %v3807_v5  ;;  %v3259_v8 = vpack.c.bf16 %v4189_v41, %v4213_v1 }
 0x1f3   :  { %v4208_v53 = vpop.eup %3509  ;;  %v3249_v50 = vpack.c.bf16 %v4199_v44, %v4197_v48 }
 0x1f4   :  { %3110 = vmatmul.mubr.msk.f32.gmra.mrb[34].mxu0 %vm487_vm1, %v3102_v13  ;;  %v3257_v6 = vpack.c.bf16 %v4208_v53, %v4203_v45  ;;  %v4220_v2 = vpop.eup %3511 }
 0x1f5   :  { %3114 = vmatmul.mubr.msk.f32.gmra.mrb[34].mxu1 %vm487_vm1, %v3102_v13  ;;  %3250 = vmatprep.subr.bf16.mxu0 %v3249_v50  ;;  %v4228_v55 = vpop.eup %3513 }
 0x1f6   :  { %3258 = vmatprep.subr.bf16.mxu1 %v3257_v6  ;;  %3252 = vmatpush1.bf16.msra.mxu0 %v3251_v7  ;;  %v4230_v56 = vpop.eup %3515 }
 0x1f7   :  { %3260 = vmatpush1.bf16.msra.mxu1 %v3259_v8  ;;  %1038 = vmatprep.mubr.f32.mxu0 %v3807_v5  ;;  %v4233_v3 = vpop.eup %3517 }
 0x1f8   :  { %1127 = vmatprep.mubr.f32.mxu1 %v3807_v5  ;;  %3111 = vmatmul.mubr.msk.f32.gmra.mrb[36].mxu0 %vm487_vm1, %v3103_v9  ;;  %v4237_v57 = vpop.eup %3519  ;;  %v3255_v15 = vpack.c.bf16 %v4233_v3, %v4220_v2 }
 0x1f9   :  { %3115 = vmatmul.mubr.msk.f32.gmra.mrb[36].mxu1 %vm487_vm1, %v3103_v9  ;;  %1044 = vmatprep.mubr.f32.mxu0 %v3807_v5  ;;  %v4244_v47 = vpop.eup %3521 }
 0x1fa   :  { %1133 = vmatprep.mubr.f32.mxu1 %v3807_v5  ;;  %v4247_v61 = vpop.eup %3523  ;;  %v3253_v4 = vpack.c.bf16 %v4244_v47, %v4228_v55 }
 0x1fb   :  { %v4251_v11 = vpop.eup %3525  ;;  %v3261_v14 = vpack.c.bf16 %v4247_v61, %v4230_v56 }
 0x1fc   :  { %3112 = vmatmul.mubr.msk.f32.gmra.mrb[38].mxu0 %vm487_vm1, %v3104_v58  ;;  %3254 = vmatprep.subr.bf16.mxu0 %v3253_v4  ;;  %v3263_v16 = vpack.c.bf16 %v4237_v57, %v4251_v11  ;;  %v4297_v4 = vpop.permute.xlu1 %947 }
 0x1fd   :  { %3116 = vmatmul.mubr.msk.f32.gmra.mrb[38].mxu1 %vm487_vm1, %v3104_v58  ;;  %3262 = vmatprep.subr.bf16.mxu1 %v3261_v14 }
 0x1fe   :  { %3256 = vmatpush1.bf16.msra.mxu0 %v3255_v15  ;;  %3264 = vmatpush1.bf16.msra.mxu1 %v3263_v16 }
 0x1ff   :  { %1204 = vmatprep.mubr.f32.mxu0 %v3807_v5  ;;  %1293 = vmatprep.mubr.f32.mxu1 %v3807_v5 }
 0x201   :  { %3117 = vmatmul.mubr.msk.f32.vlgmr.msra.gmra.mrb[40].mxu0 %vm487_vm1, %v3101_v34  ;;  %3121 = vmatmul.mubr.msk.f32.vlgmr.msra.gmra.mrb[40].mxu1 %vm487_vm1, %v3101_v34 }
 0x202   :  { %1210 = vmatprep.mubr.f32.mxu0 %v3807_v5  ;;  %1299 = vmatprep.mubr.f32.mxu1 %v3807_v5 }
 0x205   :  { %3118 = vmatmul.mubr.msk.f32.gmra.mrb[42].mxu0 %vm487_vm1, %v3102_v13  ;;  %3122 = vmatmul.mubr.msk.f32.gmra.mrb[42].mxu1 %vm487_vm1, %v3102_v13 }
 0x206   :  { %1216 = vmatprep.mubr.f32.mxu0 %v3807_v5  ;;  %1305 = vmatprep.mubr.f32.mxu1 %v3807_v5 }
 0x209   :  { %3119 = vmatmul.mubr.msk.f32.gmra.mrb[44].mxu0 %vm487_vm1, %v3103_v9  ;;  %3123 = vmatmul.mubr.msk.f32.gmra.mrb[44].mxu1 %vm487_vm1, %v3103_v9 }
 0x20a   :  { %1222 = vmatprep.mubr.f32.mxu0 %v3807_v5  ;;  %1311 = vmatprep.mubr.f32.mxu1 %v3807_v5 }
 0x20d   :  { %3120 = vmatmul.mubr.msk.f32.gmra.mrb[46].mxu0 %vm487_vm1, %v3104_v58  ;;  %3124 = vmatmul.mubr.msk.f32.gmra.mrb[46].mxu1 %vm487_vm1, %v3104_v58 }
 0x20e   :  { %1456 = vmatprep.mubr.f32.mxu0 %v3807_v5  ;;  %1545 = vmatprep.mubr.f32.mxu1 %v3807_v5 }
 0x2c3   :  { %v1028_v18 = vpop.f32.mrb[32].mxu0 }
 0x2c4   :  { %v1029_v20 = vadd.f32 %v1028_v18, %v4279_v59  ;;  %v1117_v21 = vpop.f32.mrb[32].mxu1  ;;  %v1030_v22 = vpop.f32.mrb[33].mxu0 }
 0x2c5   :  { %v1118_v23 = vadd.f32 %v1117_v21, %v4279_v59  ;;  %v1031_v24 = vadd.f32 %v1030_v22, %v4279_v59  ;;  %v1119_v25 = vpop.f32.mrb[33].mxu1 }
 0x2c6   :  { %3527 = vtanh.f32 %v1029_v20  ;;  %v1120_v26 = vadd.f32 %v1119_v25, %v4279_v59 }
 0x2c7   :  { %3529 = vtanh.f32 %v1118_v23  ;;  %v1034_v10 = vpop.f32.mrb[34].mxu0 }
 0x2c8   :  { %3531 = vtanh.f32 %v1031_v24  ;;  %v1035_v28 = vadd.f32 %v1034_v10, %v4285_v27  ;;  %v1123_v29 = vpop.f32.mrb[34].mxu1  ;;  %v1036_v30 = vpop.f32.mrb[35].mxu0 }
 0x2c9   :  { %3533 = vtanh.f32 %v1120_v26  ;;  %v1124_v31 = vadd.f32 %v1123_v29, %v4285_v27  ;;  %v1037_v32 = vadd.f32 %v1036_v30, %v4285_v27  ;;  %v1125_v34 = vpop.f32.mrb[35].mxu1 }
 0x2ca   :  { %3535 = vtanh.f32 %v1035_v28  ;;  %v1126_v35 = vadd.f32 %v1125_v34, %v4285_v27 }
 0x2cb   :  { %3537 = vtanh.f32 %v1124_v31  ;;  %v1040_v39 = vpop.f32.mrb[36].mxu0 }
 0x2cc   :  { %3539 = vtanh.f32 %v1037_v32  ;;  %v1041_v13 = vadd.f32 %v1040_v39, %v4291_v37  ;;  %v1129_v50 = vpop.f32.mrb[36].mxu1  ;;  %v1042_v6 = vpop.f32.mrb[37].mxu0 }
 0x2cd   :  { %3541 = vtanh.f32 %v1126_v35  ;;  %v1130_v7 = vadd.f32 %v1129_v50, %v4291_v37  ;;  %v1043_v8 = vadd.f32 %v1042_v6, %v4291_v37  ;;  %v1131_v9 = vpop.f32.mrb[37].mxu1 }
 0x2ce   :  { %3543 = vtanh.f32 %v1041_v13  ;;  %v1132_v58 = vadd.f32 %v1131_v9, %v4291_v37 }
 0x2cf   :  { %3545 = vtanh.f32 %v1130_v7  ;;  %v1046_v14 = vpop.f32.mrb[38].mxu0 }
 0x2d0   :  { %v3528_v15 = vpop.eup %3527  ;;  %3547 = vtanh.f32 %v1043_v8  ;;  %v1047_v16 = vadd.f32 %v1046_v14, %v4297_v4  ;;  %v1135_v18 = vpop.f32.mrb[38].mxu1 }
 0x2d1   :  { %v1048_v20 = vpop.f32.mrb[39].mxu0  ;;  %v3530_v21 = vpop.eup %3529  ;;  %3549 = vtanh.f32 %v1132_v58  ;;  %v1136_v22 = vadd.f32 %v1135_v18, %v4297_v4 }
 0x2d2   :  { %v1049_v23 = vadd.f32 %v1048_v20, %v4297_v4  ;;  %v1137_v24 = vpop.f32.mrb[39].mxu1  ;;  %v3532_v25 = vpop.eup %3531  ;;  %3551 = vtanh.f32 %v1047_v16 }
 0x2d3   :  { %v1138_v26 = vadd.f32 %v1137_v24, %v4297_v4  ;;  %v3534_v10 = vpop.eup %3533  ;;  %3553 = vtanh.f32 %v1136_v22 }
 0x2d4   :  { %v3536_v28 = vpop.eup %3535  ;;  %3555 = vtanh.f32 %v1049_v23  ;;  %v1206_v29 = vpop.f32.mrb[40].mxu0 }
 0x2d5   :  { %v3538_v30 = vpop.eup %3537  ;;  %3557 = vtanh.f32 %v1138_v26  ;;  %v1207_v31 = vadd.f32 %v1206_v29, %v4279_v59  ;;  %v1295_v32 = vpop.f32.mrb[40].mxu1  ;;  %v3267_v35 = vpack.c.bf16 %v3536_v28, %v3528_v15 }
 0x2d6   :  { %v1208_v34 = vpop.f32.mrb[41].mxu0  ;;  %v3540_v39 = vpop.eup %3539  ;;  %v1296_v13 = vadd.f32 %v1295_v32, %v4279_v59  ;;  %v3275_v7 = vpack.c.bf16 %v3538_v30, %v3530_v21 }
 0x2d7   :  { %v1209_v50 = vadd.f32 %v1208_v34, %v4279_v59  ;;  %v1297_v6 = vpop.f32.mrb[41].mxu1  ;;  %v3542_v8 = vpop.eup %3541  ;;  %3559 = vtanh.f32 %v1207_v31  ;;  %v3265_v58 = vpack.c.bf16 %v3540_v39, %v3532_v25 }
 0x2d8   :  { %v1298_v9 = vadd.f32 %v1297_v6, %v4279_v59  ;;  %v3544_v14 = vpop.eup %3543  ;;  %3561 = vtanh.f32 %v1296_v13  ;;  %v1212_v16 = vpop.f32.mrb[42].mxu0  ;;  %v3273_v18 = vpack.c.bf16 %v3542_v8, %v3534_v10 }
 0x2d9   :  { %v3546_v20 = vpop.eup %3545  ;;  %3563 = vtanh.f32 %v1209_v50  ;;  %v1213_v15 = vadd.f32 %v1212_v16, %v4285_v27  ;;  %v1301_v22 = vpop.f32.mrb[42].mxu1  ;;  %3266 = vmatprep.subr.bf16.mxu0 %v3265_v58 }
 0x2da   :  { %v1214_v23 = vpop.f32.mrb[43].mxu0  ;;  %v3548_v24 = vpop.eup %3547  ;;  %3565 = vtanh.f32 %v1298_v9  ;;  %v1302_v21 = vadd.f32 %v1301_v22, %v4285_v27  ;;  %3274 = vmatprep.subr.bf16.mxu1 %v3273_v18  ;;  %3268 = vmatpush1.bf16.msra.mxu0 %v3267_v35 }
 0x2db   :  { %v1215_v26 = vadd.f32 %v1214_v23, %v4285_v27  ;;  %v1303_v28 = vpop.f32.mrb[43].mxu1  ;;  %v3550_v59 = vpop.eup %3549  ;;  %3567 = vtanh.f32 %v1213_v15  ;;  %3276 = vmatpush1.bf16.msra.mxu1 %v3275_v7 }
 0x2dc   :  { %v1304_v25 = vadd.f32 %v1303_v28, %v4285_v27  ;;  %v3552_v10 = vpop.eup %3551  ;;  %3569 = vtanh.f32 %v1302_v21  ;;  %v1218_v29 = vpop.f32.mrb[44].mxu0 }
 0x2dd   :  { %v3554_v30 = vpop.eup %3553  ;;  %3571 = vtanh.f32 %v1215_v26  ;;  %v1219_v31 = vadd.f32 %v1218_v29, %v4291_v37  ;;  %v1307_v32 = vpop.f32.mrb[44].mxu1  ;;  %v3271_v39 = vpack.c.bf16 %v3552_v10, %v3544_v14  ;;  %v3126_v29 = vld [vmem:[%s4760_s2 + $0x48] sm:$0xff] }
 0x2de   :  { %v1220_v34 = vpop.f32.mrb[45].mxu0  ;;  %v3556_v13 = vpop.eup %3555  ;;  %3573 = vtanh.f32 %v1304_v25  ;;  %v1308_v50 = vadd.f32 %v1307_v32, %v4291_v37  ;;  %v3279_v8 = vpack.c.bf16 %v3554_v30, %v3546_v20 }
 0x2df   :  { %v1221_v35 = vadd.f32 %v1220_v34, %v4291_v37  ;;  %v1309_v6 = vpop.f32.mrb[45].mxu1  ;;  %v3558_v27 = vpop.eup %3557  ;;  %3575 = vtanh.f32 %v1219_v31  ;;  %v3269_v9 = vpack.c.bf16 %v3556_v13, %v3548_v24 }
 0x2e0   :  { %v1310_v7 = vadd.f32 %v1309_v6, %v4291_v37  ;;  %3577 = vtanh.f32 %v1308_v50  ;;  %v1224_v58 = vpop.f32.mrb[46].mxu0  ;;  %v3277_v16 = vpack.c.bf16 %v3558_v27, %v3550_v59  ;;  %v1313_v15 = vpop.f32.mrb[46].mxu1  ;;  %v3125_v37 = vld [vmem:[%s4760_s2 + $0x40] sm:$0xff] }
 0x2e1   :  { %v3560_v18 = vpop.eup %3559  ;;  %3579 = vtanh.f32 %v1221_v35  ;;  %v1225_v14 = vadd.f32 %v1224_v58, %v4297_v4  ;;  %v1226_v22 = vpop.f32.mrb[47].mxu0  ;;  %3270 = vmatprep.subr.bf16.mxu0 %v3269_v9  ;;  %v1314_v21 = vadd.f32 %v1313_v15, %v4297_v4  ;;  %v3127_v35 = vld [vmem:[%s4760_s2 + $0x50] sm:$0xff]  ;;  %v3128_v9 = vld [vmem:[%s4760_s2 + $0x58] sm:$0xff] }
 0x2e2   :  { %v3562_v23 = vpop.eup %3561  ;;  %3581 = vtanh.f32 %v1310_v7  ;;  %v1227_v20 = vadd.f32 %v1226_v22, %v4297_v4  ;;  %v1315_v26 = vpop.f32.mrb[47].mxu1  ;;  %3278 = vmatprep.subr.bf16.mxu1 %v3277_v16  ;;  %3272 = vmatpush1.bf16.msra.mxu0 %v3271_v39 }
 0x2e3   :  { %v3564_v24 = vpop.eup %3563  ;;  %3583 = vtanh.f32 %v1225_v14  ;;  %v1316_v28 = vadd.f32 %v1315_v26, %v4297_v4  ;;  %3280 = vmatpush1.bf16.msra.mxu1 %v3279_v8 }
 0x2e4   :  { %v3566_v59 = vpop.eup %3565  ;;  %3585 = vtanh.f32 %v1314_v21 }
 0x2e5   :  { %v3568_v25 = vpop.eup %3567  ;;  %3587 = vtanh.f32 %v1227_v20  ;;  %3133 = vmatmul.mubr.msk.f32.vlgmr.msra.gmra.mrb[48].mxu0 %vm487_vm1, %v3125_v37 }
 0x2e6   :  { %v3570_v10 = vpop.eup %3569  ;;  %3589 = vtanh.f32 %v1316_v28  ;;  %3137 = vmatmul.mubr.msk.f32.vlgmr.msra.gmra.mrb[48].mxu1 %vm487_vm1, %v3125_v37  ;;  %1462 = vmatprep.mubr.f32.mxu0 %v3807_v5  ;;  %v3283_v30 = vpack.c.bf16 %v3568_v25, %v3560_v18 }
 0x2e7   :  { %v3572_v31 = vpop.eup %3571  ;;  %1551 = vmatprep.mubr.f32.mxu1 %v3807_v5  ;;  %v3291_v4 = vpack.c.bf16 %v3570_v10, %v3562_v23  ;;  %v4363_v23 = vpop.permute.xlu0 %1362 }
 0x2e8   :  { %v3574_v32 = vpop.eup %3573  ;;  %v3281_v34 = vpack.c.bf16 %v3572_v31, %v3564_v24  ;;  %v4369_v10 = vpop.permute.xlu1 %1367 }
 0x2e9   :  { %v3576_v39 = vpop.eup %3575  ;;  %3134 = vmatmul.mubr.msk.f32.gmra.mrb[50].mxu0 %vm487_vm1, %v3126_v29  ;;  %v3289_v13 = vpack.c.bf16 %v3574_v32, %v3566_v59 }
 0x2ea   :  { %v3578_v50 = vpop.eup %3577  ;;  %3138 = vmatmul.mubr.msk.f32.gmra.mrb[50].mxu1 %vm487_vm1, %v3126_v29  ;;  %3282 = vmatprep.subr.bf16.mxu0 %v3281_v34 }
 0x2eb   :  { %v3580_v6 = vpop.eup %3579  ;;  %3290 = vmatprep.subr.bf16.mxu1 %v3289_v13  ;;  %3284 = vmatpush1.bf16.msra.mxu0 %v3283_v30 }
 0x2ec   :  { %v3582_v8 = vpop.eup %3581  ;;  %3292 = vmatpush1.bf16.msra.mxu1 %v3291_v4  ;;  %1468 = vmatprep.mubr.f32.mxu0 %v3807_v5 }
 0x2ed   :  { %v3584_v27 = vpop.eup %3583  ;;  %1557 = vmatprep.mubr.f32.mxu1 %v3807_v5  ;;  %3135 = vmatmul.mubr.msk.f32.gmra.mrb[52].mxu0 %vm487_vm1, %v3127_v35 }
 0x2ee   :  { %v3586_v7 = vpop.eup %3585  ;;  %3139 = vmatmul.mubr.msk.f32.gmra.mrb[52].mxu1 %vm487_vm1, %v3127_v35  ;;  %1474 = vmatprep.mubr.f32.mxu0 %v3807_v5  ;;  %v3287_v58 = vpack.c.bf16 %v3584_v27, %v3576_v39 }
 0x2ef   :  { %v3588_v16 = vpop.eup %3587  ;;  %1563 = vmatprep.mubr.f32.mxu1 %v3807_v5  ;;  %v3295_v18 = vpack.c.bf16 %v3586_v7, %v3578_v50  ;;  %v4375_v50 = vpop.permute.xlu0 %1372 }
 0x2f0   :  { %v3590_v14 = vpop.eup %3589  ;;  %v3285_v15 = vpack.c.bf16 %v3588_v16, %v3580_v6 }
 0x2f1   :  { %3136 = vmatmul.mubr.msk.f32.gmra.mrb[54].mxu0 %vm487_vm1, %v3128_v9  ;;  %v3293_v22 = vpack.c.bf16 %v3590_v14, %v3582_v8 }
 0x2f2   :  { %3140 = vmatmul.mubr.msk.f32.gmra.mrb[54].mxu1 %vm487_vm1, %v3128_v9  ;;  %3286 = vmatprep.subr.bf16.mxu0 %v3285_v15 }
 0x2f3   :  { %3294 = vmatprep.subr.bf16.mxu1 %v3293_v22  ;;  %3288 = vmatpush1.bf16.msra.mxu0 %v3287_v58 }
 0x2f4   :  { %3296 = vmatpush1.bf16.msra.mxu1 %v3295_v18  ;;  %1634 = vmatprep.mubr.f32.mxu0 %v3807_v5  ;;  %v4381_v18 = vpop.permute.xlu1 %1377 }
 0x2f5   :  { %1723 = vmatprep.mubr.f32.mxu1 %v3807_v5 }
 0x2f6   :  { %3141 = vmatmul.mubr.msk.f32.vlgmr.msra.gmra.mrb[56].mxu0 %vm487_vm1, %v3125_v37 }
 0x2f7   :  { %3145 = vmatmul.mubr.msk.f32.vlgmr.msra.gmra.mrb[56].mxu1 %vm487_vm1, %v3125_v37  ;;  %1640 = vmatprep.mubr.f32.mxu0 %v3807_v5 }
 0x2f8   :  { %1729 = vmatprep.mubr.f32.mxu1 %v3807_v5 }
 0x2fa   :  { %3142 = vmatmul.mubr.msk.f32.gmra.mrb[58].mxu0 %vm487_vm1, %v3126_v29 }
 0x2fb   :  { %3146 = vmatmul.mubr.msk.f32.gmra.mrb[58].mxu1 %vm487_vm1, %v3126_v29  ;;  %1646 = vmatprep.mubr.f32.mxu0 %v3807_v5 }
 0x2fc   :  { %1735 = vmatprep.mubr.f32.mxu1 %v3807_v5 }
 0x2fe   :  { %3143 = vmatmul.mubr.msk.f32.gmra.mrb[60].mxu0 %vm487_vm1, %v3127_v35 }
 0x2ff   :  { %3147 = vmatmul.mubr.msk.f32.gmra.mrb[60].mxu1 %vm487_vm1, %v3127_v35  ;;  %1652 = vmatprep.mubr.f32.mxu0 %v3807_v5 }
 0x300   :  { %1741 = vmatprep.mubr.f32.mxu1 %v3807_v5 }
 0x302   :  { %3144 = vmatmul.mubr.msk.f32.gmra.mrb[62].mxu0 %vm487_vm1, %v3128_v9 }
 0x303   :  { %3148 = vmatmul.mubr.msk.f32.gmra.mrb[62].mxu1 %vm487_vm1, %v3128_v9  ;;  %1918 = vmatprep.mubr.f32.mxu0 %v3807_v5 }
 0x304   :  { %2007 = vmatprep.mubr.f32.mxu1 %v3807_v5 }
 0x3b8   :  { %v1458_v21 = vpop.f32.mrb[48].mxu0 }
 0x3b9   :  { %v1459_v20 = vadd.f32 %v1458_v21, %v4363_v23  ;;  %v1547_v26 = vpop.f32.mrb[48].mxu1  ;;  %v1460_v37 = vpop.f32.mrb[49].mxu0 }
 0x3ba   :  { %v1548_v24 = vadd.f32 %v1547_v26, %v4363_v23  ;;  %v1461_v28 = vadd.f32 %v1460_v37, %v4363_v23  ;;  %v1549_v59 = vpop.f32.mrb[49].mxu1 }
 0x3bb   :  { %3591 = vtanh.f32 %v1459_v20  ;;  %v1550_v25 = vadd.f32 %v1549_v59, %v4363_v23 }
 0x3bc   :  { %3593 = vtanh.f32 %v1548_v24  ;;  %v1464_v29 = vpop.f32.mrb[50].mxu0 }
 0x3bd   :  { %3595 = vtanh.f32 %v1461_v28  ;;  %v1465_v30 = vadd.f32 %v1464_v29, %v4369_v10  ;;  %v1553_v31 = vpop.f32.mrb[50].mxu1  ;;  %v1466_v4 = vpop.f32.mrb[51].mxu0 }
 0x3be   :  { %3597 = vtanh.f32 %v1550_v25  ;;  %v1554_v32 = vadd.f32 %v1553_v31, %v4369_v10  ;;  %v1467_v34 = vadd.f32 %v1466_v4, %v4369_v10  ;;  %v1555_v39 = vpop.f32.mrb[51].mxu1 }
 0x3bf   :  { %3599 = vtanh.f32 %v1465_v30  ;;  %v1556_v13 = vadd.f32 %v1555_v39, %v4369_v10 }
 0x3c0   :  { %3601 = vtanh.f32 %v1554_v32  ;;  %v1470_v35 = vpop.f32.mrb[52].mxu0 }
 0x3c1   :  { %3603 = vtanh.f32 %v1467_v34  ;;  %v1471_v6 = vadd.f32 %v1470_v35, %v4375_v50  ;;  %v1559_v8 = vpop.f32.mrb[52].mxu1  ;;  %v1472_v27 = vpop.f32.mrb[53].mxu0 }
 0x3c2   :  { %3605 = vtanh.f32 %v1556_v13  ;;  %v1560_v7 = vadd.f32 %v1559_v8, %v4375_v50  ;;  %v1473_v9 = vadd.f32 %v1472_v27, %v4375_v50  ;;  %v1561_v58 = vpop.f32.mrb[53].mxu1 }
 0x3c3   :  { %3607 = vtanh.f32 %v1471_v6  ;;  %v1562_v16 = vadd.f32 %v1561_v58, %v4375_v50 }
 0x3c4   :  { %3609 = vtanh.f32 %v1560_v7  ;;  %v1476_v14 = vpop.f32.mrb[54].mxu0 }
 0x3c5   :  { %v3592_v15 = vpop.eup %3591  ;;  %3611 = vtanh.f32 %v1473_v9  ;;  %v1477_v22 = vadd.f32 %v1476_v14, %v4381_v18  ;;  %v1565_v21 = vpop.f32.mrb[54].mxu1 }
 0x3c6   :  { %v1478_v20 = vpop.f32.mrb[55].mxu0  ;;  %v3594_v26 = vpop.eup %3593  ;;  %3613 = vtanh.f32 %v1562_v16  ;;  %v1566_v37 = vadd.f32 %v1565_v21, %v4381_v18  ;;  %v4397_v9 = vadd.f32 %v3592_v15, %v4132_v49 }
 0x3c7   :  { %v1479_v24 = vadd.f32 %v1478_v20, %v4381_v18  ;;  %v1567_v28 = vpop.f32.mrb[55].mxu1  ;;  %v3596_v59 = vpop.eup %3595  ;;  %3615 = vtanh.f32 %v1477_v22  ;;  %v4413_v49 = vadd.f32 %v3594_v26, %v4139_v0 }
 0x3c8   :  { %v1568_v25 = vadd.f32 %v1567_v28, %v4381_v18  ;;  %v3598_v29 = vpop.eup %3597  ;;  %3617 = vtanh.f32 %v1566_v37  ;;  %v4394_v7 = vadd.f32 %v3596_v59, %v4122_v42 }
 0x3c9   :  { %v3600_v30 = vpop.eup %3599  ;;  %3619 = vtanh.f32 %v1479_v24  ;;  %v1636_v31 = vpop.f32.mrb[56].mxu0  ;;  %v4407_v20 = vadd.f32 %v3598_v29, %v4129_v46 }
 0x3ca   :  { %v3602_v4 = vpop.eup %3601  ;;  %3621 = vtanh.f32 %v1568_v25  ;;  %v1637_v32 = vadd.f32 %v1636_v31, %v4363_v23  ;;  %v1725_v34 = vpop.f32.mrb[56].mxu1  ;;  %v4389_v13 = vadd.f32 %v3600_v30, %v4115_v33 }
 0x3cb   :  { %v1638_v39 = vpop.f32.mrb[57].mxu0  ;;  %v3604_v35 = vpop.eup %3603  ;;  %v1726_v6 = vadd.f32 %v1725_v34, %v4363_v23  ;;  %v4404_v33 = vadd.f32 %v3602_v4, %v4117_v36 }
 0x3cc   :  { %v1639_v8 = vadd.f32 %v1638_v39, %v4363_v23  ;;  %v1727_v27 = vpop.f32.mrb[57].mxu1  ;;  %v3606_v58 = vpop.eup %3605  ;;  %3623 = vtanh.f32 %v1637_v32  ;;  %v4401_v14 = vadd.f32 %v3604_v35, %v4124_v43  ;;  %v3299_v24 = vpack.c.bf16 %v4389_v13, %v4397_v9 }
 0x3cd   :  { %v1728_v16 = vadd.f32 %v1727_v27, %v4363_v23  ;;  %v3608_v22 = vpop.eup %3607  ;;  %3625 = vtanh.f32 %v1726_v6  ;;  %v1642_v21 = vpop.f32.mrb[58].mxu0  ;;  %v4410_v42 = vadd.f32 %v3606_v58, %v4134_v38  ;;  %v3307_v29 = vpack.c.bf16 %v4404_v33, %v4413_v49 }
 0x3ce   :  { %v3610_v15 = vpop.eup %3609  ;;  %3627 = vtanh.f32 %v1639_v8  ;;  %v1643_v43 = vadd.f32 %v1642_v21, %v4369_v10  ;;  %v1731_v23 = vpop.f32.mrb[58].mxu1  ;;  %v3297_v36 = vpack.c.bf16 %v4401_v14, %v4394_v7  ;;  %v4429_v35 = vadd.f32 %v3608_v22, %v4141_v52 }
 0x3cf   :  { %v1644_v37 = vpop.f32.mrb[59].mxu0  ;;  %v3612_v46 = vpop.eup %3611  ;;  %3629 = vtanh.f32 %v1728_v16  ;;  %v1732_v38 = vadd.f32 %v1731_v23, %v4369_v10  ;;  %v3305_v26 = vpack.c.bf16 %v4410_v42, %v4407_v20 }
 0x3d0   :  { %v1645_v28 = vadd.f32 %v1644_v37, %v4369_v10  ;;  %v1733_v0 = vpop.f32.mrb[59].mxu1  ;;  %v3614_v59 = vpop.eup %3613  ;;  %3631 = vtanh.f32 %v1643_v43  ;;  %3298 = vmatprep.subr.bf16.mxu0 %v3297_v36  ;;  %v4437_v16 = vadd.f32 %v3612_v46, %v4153_v60  ;;  %v4453_v60 = vadd.f32 %v3610_v15, %v4147_v54 }
 0x3d1   :  { %v1734_v25 = vadd.f32 %v1733_v0, %v4369_v10  ;;  %v3616_v30 = vpop.eup %3615  ;;  %3633 = vtanh.f32 %v1732_v38  ;;  %3306 = vmatprep.subr.bf16.mxu1 %v3305_v26  ;;  %v1648_v31 = vpop.f32.mrb[60].mxu0  ;;  %3300 = vmatpush1.bf16.msra.mxu0 %v3299_v24  ;;  %v4447_v23 = vadd.f32 %v3614_v59, %v4157_v62 }
 0x3d2   :  { %v3618_v4 = vpop.eup %3617  ;;  %3635 = vtanh.f32 %v1645_v28  ;;  %v1649_v32 = vadd.f32 %v1648_v31, %v4375_v50  ;;  %v1737_v34 = vpop.f32.mrb[60].mxu1  ;;  %3308 = vmatpush1.bf16.msra.mxu1 %v3307_v29  ;;  %v4432_v10 = vadd.f32 %v3616_v30, %v4159_v63 }
 0x3d3   :  { %v1650_v39 = vpop.f32.mrb[61].mxu0  ;;  %v3620_v6 = vpop.eup %3619  ;;  %3637 = vtanh.f32 %v1734_v25  ;;  %v1738_v8 = vadd.f32 %v1737_v34, %v4375_v50  ;;  %v4444_v63 = vadd.f32 %v3618_v4, %v4161_v12  ;;  %v4470_v25 = vld [vmem:[%s4760_s2 + $0x60] sm:$0xff] }
 0x3d4   :  { %v1651_v27 = vadd.f32 %v1650_v39, %v4375_v50  ;;  %v1739_v58 = vpop.f32.mrb[61].mxu1  ;;  %v3622_v21 = vpop.eup %3621  ;;  %3639 = vtanh.f32 %v1649_v32  ;;  %v4441_v52 = vadd.f32 %v3620_v6, %v4164_v17  ;;  %v3303_v46 = vpack.c.bf16 %v4432_v10, %v4429_v35  ;;  %v3150_v32 = vld [vmem:[%s4760_s2 + $0x68] sm:$0xff] }
 0x3d5   :  { %v1740_v43 = vadd.f32 %v1739_v58, %v4375_v50  ;;  %3641 = vtanh.f32 %v1738_v8  ;;  %v1654_v22 = vpop.f32.mrb[62].mxu0  ;;  %v4450_v37 = vadd.f32 %v3622_v21, %v4168_v19  ;;  %v3311_v26 = vpack.c.bf16 %v4444_v63, %v4453_v60 }
 0x3d6   :  { %v3624_v36 = vpop.eup %3623  ;;  %3643 = vtanh.f32 %v1651_v27  ;;  %v1655_v50 = vadd.f32 %v1654_v22, %v4381_v18  ;;  %v1743_v17 = vpop.f32.mrb[62].mxu1  ;;  %v3301_v12 = vpack.c.bf16 %v4441_v52, %v4437_v16 }
 0x3d7   :  { %v1656_v24 = vpop.f32.mrb[63].mxu0  ;;  %v3626_v62 = vpop.eup %3625  ;;  %3645 = vtanh.f32 %v1740_v43  ;;  %v1744_v19 = vadd.f32 %v1743_v17, %v4381_v18  ;;  %v3309_v15 = vpack.c.bf16 %v4450_v37, %v4447_v23  ;;  %v4500_v58 = vadd.f32 %v3624_v36, %v4206_v51 }
 0x3d8   :  { %v1657_v38 = vadd.f32 %v1656_v24, %v4381_v18  ;;  %v1745_v54 = vpop.f32.mrb[63].mxu1  ;;  %v3628_v28 = vpop.eup %3627  ;;  %3647 = vtanh.f32 %v1655_v50  ;;  %3302 = vmatprep.subr.bf16.mxu0 %v3301_v12  ;;  %v4505_v21 = vadd.f32 %v3626_v62, %v4213_v1  ;;  %v3151_v1 = vld [vmem:[%s4760_s2 + $0x70] sm:$0xff]  ;;  %v3152_v12 = vld [vmem:[%s4760_s2 + $0x78] sm:$0xff] }
 0x3d9   :  { %v1746_v0 = vadd.f32 %v1745_v54, %v4381_v18  ;;  %v3630_v59 = vpop.eup %3629  ;;  %3649 = vtanh.f32 %v1744_v19  ;;  %3310 = vmatprep.subr.bf16.mxu1 %v3309_v15  ;;  %3304 = vmatpush1.bf16.msra.mxu0 %v3303_v46  ;;  %v4484_v34 = vadd.f32 %v3628_v28, %v4197_v48 }
 0x3da   :  { %v3632_v29 = vpop.eup %3631  ;;  %3651 = vtanh.f32 %v1657_v38  ;;  %3312 = vmatpush1.bf16.msra.mxu1 %v3311_v26  ;;  %v4494_v8 = vadd.f32 %v3630_v59, %v4203_v45 }
 0x3db   :  { %v3634_v30 = vpop.eup %3633  ;;  %3653 = vtanh.f32 %v1746_v0  ;;  %v4475_v18 = vadd.f32 %v3632_v29, %v4186_v40 }
 0x3dc   :  { %v3636_v31 = vpop.eup %3635  ;;  %3157 = vmatmul.mubr.msk.f32.vlgmr.msra.gmra.mrb[64].mxu0 %vm487_vm1, %v4470_v25  ;;  %v4490_v6 = vadd.f32 %v3634_v30, %v4189_v41  ;;  %v4587_v30 = vpop.permute.xlu1 %1829 }
 0x3dd   :  { %v3638_v4 = vpop.eup %3637  ;;  %3161 = vmatmul.mubr.msk.f32.vlgmr.msra.gmra.mrb[64].mxu1 %vm487_vm1, %v4470_v25  ;;  %1924 = vmatprep.mubr.f32.mxu0 %v3807_v5  ;;  %v4487_v39 = vadd.f32 %v3636_v31, %v4199_v44 }
 0x3de   :  { %v3640_v40 = vpop.eup %3639  ;;  %2013 = vmatprep.mubr.f32.mxu1 %v3807_v5  ;;  %v4497_v27 = vadd.f32 %v3638_v4, %v4208_v53  ;;  %v3315_v53 = vpack.c.bf16 %v4475_v18, %v4500_v58  ;;  %v3323_v51 = vpack.c.bf16 %v4490_v6, %v4505_v21 }
 0x3df   :  { %v3642_v48 = vpop.eup %3641  ;;  %v3313_v44 = vpack.c.bf16 %v4487_v39, %v4484_v34  ;;  %v4546_v54 = vadd.f32 %v3640_v40, %v4220_v2 }
 0x3e0   :  { %v3644_v41 = vpop.eup %3643  ;;  %3158 = vmatmul.mubr.msk.f32.gmra.mrb[66].mxu0 %vm487_vm1, %v3150_v32  ;;  %v3321_v45 = vpack.c.bf16 %v4497_v27, %v4494_v8 }
 0x3e1   :  { %v3646_v43 = vpop.eup %3645  ;;  %3162 = vmatmul.mubr.msk.f32.gmra.mrb[66].mxu1 %vm487_vm1, %v3150_v32  ;;  %3314 = vmatprep.subr.bf16.mxu0 %v3313_v44  ;;  %v4530_v46 = vadd.f32 %v3644_v41, %v4228_v55 }
 0x3e2   :  { %v3648_v22 = vpop.eup %3647  ;;  %3322 = vmatprep.subr.bf16.mxu1 %v3321_v45  ;;  %3316 = vmatpush1.bf16.msra.mxu0 %v3315_v53 }
 0x3e3   :  { %v3650_v36 = vpop.eup %3649  ;;  %3324 = vmatpush1.bf16.msra.mxu1 %v3323_v51  ;;  %1930 = vmatprep.mubr.f32.mxu0 %v3807_v5  ;;  %v4522_v17 = vadd.f32 %v3648_v22, %v4233_v3  ;;  %v4540_v3 = vadd.f32 %v3646_v43, %v4230_v56 }
 0x3e4   :  { %v3652_v50 = vpop.eup %3651  ;;  %2019 = vmatprep.mubr.f32.mxu1 %v3807_v5  ;;  %3159 = vmatmul.mubr.msk.f32.gmra.mrb[68].mxu0 %vm487_vm1, %v3151_v1  ;;  %v4536_v19 = vadd.f32 %v3650_v36, %v4237_v57 }
 0x3e5   :  { %v3654_v24 = vpop.eup %3653  ;;  %3163 = vmatmul.mubr.msk.f32.gmra.mrb[68].mxu1 %vm487_vm1, %v3151_v1  ;;  %1936 = vmatprep.mubr.f32.mxu0 %v3807_v5  ;;  %v4533_v62 = vadd.f32 %v3652_v50, %v4244_v47  ;;  %v4551_v47 = vadd.f32 %v3642_v48, %v4251_v11  ;;  %v3319_v56 = vpack.c.bf16 %v4522_v17, %v4546_v54 }
 0x3e6   :  { %2025 = vmatprep.mubr.f32.mxu1 %v3807_v5  ;;  %v4543_v38 = vadd.f32 %v3654_v24, %v4247_v61  ;;  %v4581_v61 = vpop.permute.xlu0 %1824 }
 0x3e7   :  { %v3317_v55 = vpack.c.bf16 %v4533_v62, %v4530_v46  ;;  %v3327_v2 = vpack.c.bf16 %v4536_v19, %v4551_v47 }
 0x3e8   :  { %3160 = vmatmul.mubr.msk.f32.gmra.mrb[70].mxu0 %vm487_vm1, %v3152_v12  ;;  %v3325_v57 = vpack.c.bf16 %v4543_v38, %v4540_v3 }
 0x3e9   :  { %3164 = vmatmul.mubr.msk.f32.gmra.mrb[70].mxu1 %vm487_vm1, %v3152_v12  ;;  %3318 = vmatprep.subr.bf16.mxu0 %v3317_v55  ;;  %v4599_v55 = vpop.permute.xlu1 %1839 }
 0x3ea   :  { %3326 = vmatprep.subr.bf16.mxu1 %v3325_v57  ;;  %3320 = vmatpush1.bf16.msra.mxu0 %v3319_v56  ;;  %v4593_v53 = vpop.permute.xlu0 %1834 }
 0x3eb   :  { %3328 = vmatpush1.bf16.msra.mxu1 %v3327_v2  ;;  %2096 = vmatprep.mubr.f32.mxu0 %v3807_v5 }
 0x3ec   :  { %2185 = vmatprep.mubr.f32.mxu1 %v3807_v5 }
 0x3ed   :  { %3165 = vmatmul.mubr.msk.f32.vlgmr.msra.gmra.mrb[72].mxu0 %vm487_vm1, %v4470_v25 }
 0x3ee   :  { %3169 = vmatmul.mubr.msk.f32.vlgmr.msra.gmra.mrb[72].mxu1 %vm487_vm1, %v4470_v25  ;;  %2102 = vmatprep.mubr.f32.mxu0 %v3807_v5 }
 0x3ef   :  { %2191 = vmatprep.mubr.f32.mxu1 %v3807_v5 }
 0x3f1   :  { %3166 = vmatmul.mubr.msk.f32.gmra.mrb[74].mxu0 %vm487_vm1, %v3150_v32 }
 0x3f2   :  { %3170 = vmatmul.mubr.msk.f32.gmra.mrb[74].mxu1 %vm487_vm1, %v3150_v32  ;;  %2108 = vmatprep.mubr.f32.mxu0 %v3807_v5 }
 0x3f3   :  { %2197 = vmatprep.mubr.f32.mxu1 %v3807_v5 }
 0x3f5   :  { %3167 = vmatmul.mubr.msk.f32.gmra.mrb[76].mxu0 %vm487_vm1, %v3151_v1 }
 0x3f6   :  { %3171 = vmatmul.mubr.msk.f32.gmra.mrb[76].mxu1 %vm487_vm1, %v3151_v1  ;;  %2114 = vmatprep.mubr.f32.mxu0 %v3807_v5 }
 0x3f7   :  { %2203 = vmatprep.mubr.f32.mxu1 %v3807_v5 }
 0x3f9   :  { %3168 = vmatmul.mubr.msk.f32.gmra.mrb[78].mxu0 %vm487_vm1, %v3152_v12 }
 0x3fa   :  { %3172 = vmatmul.mubr.msk.f32.gmra.mrb[78].mxu1 %vm487_vm1, %v3152_v12  ;;  %2348 = vmatprep.mubr.f32.mxu0 %v3807_v5 }
 0x3fb   :  { %2437 = vmatprep.mubr.f32.mxu1 %v3807_v5 }
 0x4af   :  { %v1920_v11 = vpop.f32.mrb[64].mxu0 }
 0x4b0   :  { %v1921_v15 = vadd.f32 %v1920_v11, %v4581_v61  ;;  %v2009_v28 = vpop.f32.mrb[64].mxu1  ;;  %v1922_v0 = vpop.f32.mrb[65].mxu0 }
 0x4b1   :  { %v2010_v26 = vadd.f32 %v2009_v28, %v4581_v61  ;;  %v1923_v59 = vadd.f32 %v1922_v0, %v4581_v61  ;;  %v2011_v25 = vpop.f32.mrb[65].mxu1 }
 0x4b2   :  { %3655 = vtanh.f32 %v1921_v15  ;;  %v2012_v29 = vadd.f32 %v2011_v25, %v4581_v61 }
 0x4b3   :  { %3657 = vtanh.f32 %v2010_v26  ;;  %v1926_v31 = vpop.f32.mrb[66].mxu0 }
 0x4b4   :  { %3659 = vtanh.f32 %v1923_v59  ;;  %v1927_v4 = vadd.f32 %v1926_v31, %v4587_v30  ;;  %v2015_v32 = vpop.f32.mrb[66].mxu1  ;;  %v1928_v40 = vpop.f32.mrb[67].mxu0 }
 0x4b5   :  { %3661 = vtanh.f32 %v2012_v29  ;;  %v2016_v48 = vadd.f32 %v2015_v32, %v4587_v30  ;;  %v1929_v44 = vadd.f32 %v1928_v40, %v4587_v30  ;;  %v2017_v41 = vpop.f32.mrb[67].mxu1 }
 0x4b6   :  { %3663 = vtanh.f32 %v1927_v4  ;;  %v2018_v45 = vadd.f32 %v2017_v41, %v4587_v30 }
 0x4b7   :  { %3665 = vtanh.f32 %v2016_v48  ;;  %v1932_v43 = vpop.f32.mrb[68].mxu0 }
 0x4b8   :  { %3667 = vtanh.f32 %v1929_v44  ;;  %v1933_v51 = vadd.f32 %v1932_v43, %v4593_v53  ;;  %v2021_v1 = vpop.f32.mrb[68].mxu1  ;;  %v1934_v22 = vpop.f32.mrb[69].mxu0 }
 0x4b9   :  { %3669 = vtanh.f32 %v2018_v45  ;;  %v2022_v36 = vadd.f32 %v2021_v1, %v4593_v53  ;;  %v1935_v50 = vadd.f32 %v1934_v22, %v4593_v53  ;;  %v2023_v24 = vpop.f32.mrb[69].mxu1 }
 0x4ba   :  { %3671 = vtanh.f32 %v1933_v51  ;;  %v2024_v12 = vadd.f32 %v2023_v24, %v4593_v53 }
 0x4bb   :  { %3673 = vtanh.f32 %v2022_v36  ;;  %v1938_v57 = vpop.f32.mrb[70].mxu0 }
 0x4bc   :  { %v3656_v56 = vpop.eup %3655  ;;  %3675 = vtanh.f32 %v1935_v50  ;;  %v1939_v2 = vadd.f32 %v1938_v57, %v4599_v55  ;;  %v2027_v11 = vpop.f32.mrb[70].mxu1 }
 0x4bd   :  { %v1940_v15 = vpop.f32.mrb[71].mxu0  ;;  %v3658_v28 = vpop.eup %3657  ;;  %3677 = vtanh.f32 %v2024_v12  ;;  %v2028_v0 = vadd.f32 %v2027_v11, %v4599_v55 }
 0x4be   :  { %v1941_v26 = vadd.f32 %v1940_v15, %v4599_v55  ;;  %v2029_v59 = vpop.f32.mrb[71].mxu1  ;;  %v3660_v25 = vpop.eup %3659  ;;  %3679 = vtanh.f32 %v1939_v2 }
 0x4bf   :  { %v2030_v29 = vadd.f32 %v2029_v59, %v4599_v55  ;;  %v3662_v31 = vpop.eup %3661  ;;  %3681 = vtanh.f32 %v2028_v0 }
 0x4c0   :  { %v3664_v4 = vpop.eup %3663  ;;  %3683 = vtanh.f32 %v1941_v26  ;;  %v2098_v32 = vpop.f32.mrb[72].mxu0 }
 0x4c1   :  { %v3666_v40 = vpop.eup %3665  ;;  %3685 = vtanh.f32 %v2030_v29  ;;  %v2099_v48 = vadd.f32 %v2098_v32, %v4581_v61  ;;  %v2187_v44 = vpop.f32.mrb[72].mxu1  ;;  %v3331_v45 = vpack.c.bf16 %v3664_v4, %v3656_v56 }
 0x4c2   :  { %v2100_v41 = vpop.f32.mrb[73].mxu0  ;;  %v3668_v43 = vpop.eup %3667  ;;  %v2188_v51 = vadd.f32 %v2187_v44, %v4581_v61  ;;  %v3339_v36 = vpack.c.bf16 %v3666_v40, %v3658_v28 }
 0x4c3   :  { %v2101_v1 = vadd.f32 %v2100_v41, %v4581_v61  ;;  %v2189_v22 = vpop.f32.mrb[73].mxu1  ;;  %v3670_v50 = vpop.eup %3669  ;;  %3687 = vtanh.f32 %v2099_v48  ;;  %v3329_v12 = vpack.c.bf16 %v3668_v43, %v3660_v25 }
 0x4c4   :  { %v2190_v24 = vadd.f32 %v2189_v22, %v4581_v61  ;;  %v3672_v57 = vpop.eup %3671  ;;  %3689 = vtanh.f32 %v2188_v51  ;;  %v2104_v2 = vpop.f32.mrb[74].mxu0  ;;  %v3337_v11 = vpack.c.bf16 %v3670_v50, %v3662_v31 }
 0x4c5   :  { %v3674_v15 = vpop.eup %3673  ;;  %3691 = vtanh.f32 %v2101_v1  ;;  %v2105_v56 = vadd.f32 %v2104_v2, %v4587_v30  ;;  %v2193_v0 = vpop.f32.mrb[74].mxu1  ;;  %3330 = vmatprep.subr.bf16.mxu0 %v3329_v12 }
 0x4c6   :  { %v2106_v26 = vpop.f32.mrb[75].mxu0  ;;  %v3676_v59 = vpop.eup %3675  ;;  %3693 = vtanh.f32 %v2190_v24  ;;  %v2194_v28 = vadd.f32 %v2193_v0, %v4587_v30  ;;  %3338 = vmatprep.subr.bf16.mxu1 %v3337_v11  ;;  %3332 = vmatpush1.bf16.msra.mxu0 %v3331_v45 }
 0x4c7   :  { %v2107_v29 = vadd.f32 %v2106_v26, %v4587_v30  ;;  %v2195_v4 = vpop.f32.mrb[75].mxu1  ;;  %v3678_v61 = vpop.eup %3677  ;;  %3695 = vtanh.f32 %v2105_v56  ;;  %3340 = vmatpush1.bf16.msra.mxu1 %v3339_v36 }
 0x4c8   :  { %v2196_v25 = vadd.f32 %v2195_v4, %v4587_v30  ;;  %v3680_v31 = vpop.eup %3679  ;;  %3697 = vtanh.f32 %v2194_v28  ;;  %v2110_v32 = vpop.f32.mrb[76].mxu0 }
 0x4c9   :  { %v3682_v40 = vpop.eup %3681  ;;  %3699 = vtanh.f32 %v2107_v29  ;;  %v2111_v48 = vadd.f32 %v2110_v32, %v4593_v53  ;;  %v2199_v44 = vpop.f32.mrb[76].mxu1  ;;  %v3335_v43 = vpack.c.bf16 %v3680_v31, %v3672_v57  ;;  %v3174_v32 = vld [vmem:[%s4760_s2 + $0x88] sm:$0xff] }
 0x4ca   :  { %v2112_v41 = vpop.f32.mrb[77].mxu0  ;;  %v3684_v51 = vpop.eup %3683  ;;  %3701 = vtanh.f32 %v2196_v25  ;;  %v2200_v1 = vadd.f32 %v2199_v44, %v4593_v53  ;;  %v3343_v50 = vpack.c.bf16 %v3682_v40, %v3674_v15 }
 0x4cb   :  { %v2113_v45 = vadd.f32 %v2112_v41, %v4593_v53  ;;  %v2201_v22 = vpop.f32.mrb[77].mxu1  ;;  %v3686_v30 = vpop.eup %3685  ;;  %3703 = vtanh.f32 %v2111_v48  ;;  %v3333_v24 = vpack.c.bf16 %v3684_v51, %v3676_v59 }
 0x4cc   :  { %v2202_v36 = vadd.f32 %v2201_v22, %v4593_v53  ;;  %3705 = vtanh.f32 %v2200_v1  ;;  %v2116_v12 = vpop.f32.mrb[78].mxu0  ;;  %v3341_v2 = vpack.c.bf16 %v3686_v30, %v3678_v61  ;;  %v3173_v53 = vld [vmem:[%s4760_s2 + $0x80] sm:$0xff] }
 0x4cd   :  { %v3688_v11 = vpop.eup %3687  ;;  %3707 = vtanh.f32 %v2113_v45  ;;  %v2117_v57 = vadd.f32 %v2116_v12, %v4599_v55  ;;  %v2205_v56 = vpop.f32.mrb[78].mxu1  ;;  %3334 = vmatprep.subr.bf16.mxu0 %v3333_v24  ;;  %v3175_v45 = vld [vmem:[%s4760_s2 + $0x90] sm:$0xff]  ;;  %v3176_v24 = vld [vmem:[%s4760_s2 + $0x98] sm:$0xff] }
 0x4ce   :  { %v2118_v0 = vpop.f32.mrb[79].mxu0  ;;  %v3690_v26 = vpop.eup %3689  ;;  %3709 = vtanh.f32 %v2202_v36  ;;  %v2206_v28 = vadd.f32 %v2205_v56, %v4599_v55  ;;  %3342 = vmatprep.subr.bf16.mxu1 %v3341_v2  ;;  %3336 = vmatpush1.bf16.msra.mxu0 %v3335_v43 }
 0x4cf   :  { %v2119_v15 = vadd.f32 %v2118_v0, %v4599_v55  ;;  %v2207_v29 = vpop.f32.mrb[79].mxu1  ;;  %v3692_v59 = vpop.eup %3691  ;;  %3711 = vtanh.f32 %v2117_v57  ;;  %3344 = vmatpush1.bf16.msra.mxu1 %v3343_v50 }
 0x4d0   :  { %v2208_v4 = vadd.f32 %v2207_v29, %v4599_v55  ;;  %v3694_v61 = vpop.eup %3693  ;;  %3713 = vtanh.f32 %v2206_v28 }
 0x4d1   :  { %v3696_v25 = vpop.eup %3695  ;;  %3715 = vtanh.f32 %v2119_v15  ;;  %3181 = vmatmul.mubr.msk.f32.vlgmr.msra.gmra.mrb[80].mxu0 %vm487_vm1, %v3173_v53 }
 0x4d2   :  { %v3698_v31 = vpop.eup %3697  ;;  %3717 = vtanh.f32 %v2208_v4  ;;  %3185 = vmatmul.mubr.msk.f32.vlgmr.msra.gmra.mrb[80].mxu1 %vm487_vm1, %v3173_v53  ;;  %2354 = vmatprep.mubr.f32.mxu0 %v3807_v5  ;;  %v3347_v40 = vpack.c.bf16 %v3696_v25, %v3688_v11 }
 0x4d3   :  { %v3700_v48 = vpop.eup %3699  ;;  %2443 = vmatprep.mubr.f32.mxu1 %v3807_v5  ;;  %v3355_v55 = vpack.c.bf16 %v3698_v31, %v3690_v26  ;;  %v4665_v26 = vpop.permute.xlu0 %2254 }
 0x4d4   :  { %v3702_v44 = vpop.eup %3701  ;;  %v3345_v41 = vpack.c.bf16 %v3700_v48, %v3692_v59  ;;  %v4671_v31 = vpop.permute.xlu1 %2259 }
 0x4d5   :  { %v3704_v43 = vpop.eup %3703  ;;  %3182 = vmatmul.mubr.msk.f32.gmra.mrb[82].mxu0 %vm487_vm1, %v3174_v32  ;;  %v3353_v51 = vpack.c.bf16 %v3702_v44, %v3694_v61 }
 0x4d6   :  { %v3706_v1 = vpop.eup %3705  ;;  %3186 = vmatmul.mubr.msk.f32.gmra.mrb[82].mxu1 %vm487_vm1, %v3174_v32  ;;  %3346 = vmatprep.subr.bf16.mxu0 %v3345_v41 }
 0x4d7   :  { %v3708_v22 = vpop.eup %3707  ;;  %3354 = vmatprep.subr.bf16.mxu1 %v3353_v51  ;;  %3348 = vmatpush1.bf16.msra.mxu0 %v3347_v40 }
 0x4d8   :  { %v3710_v50 = vpop.eup %3709  ;;  %3356 = vmatpush1.bf16.msra.mxu1 %v3355_v55  ;;  %2360 = vmatprep.mubr.f32.mxu0 %v3807_v5 }
 0x4d9   :  { %v3712_v30 = vpop.eup %3711  ;;  %2449 = vmatprep.mubr.f32.mxu1 %v3807_v5  ;;  %3183 = vmatmul.mubr.msk.f32.gmra.mrb[84].mxu0 %vm487_vm1, %v3175_v45 }
 0x4da   :  { %v3714_v36 = vpop.eup %3713  ;;  %3187 = vmatmul.mubr.msk.f32.gmra.mrb[84].mxu1 %vm487_vm1, %v3175_v45  ;;  %2366 = vmatprep.mubr.f32.mxu0 %v3807_v5  ;;  %v3351_v12 = vpack.c.bf16 %v3712_v30, %v3704_v43 }
 0x4db   :  { %v3716_v2 = vpop.eup %3715  ;;  %2455 = vmatprep.mubr.f32.mxu1 %v3807_v5  ;;  %v3359_v11 = vpack.c.bf16 %v3714_v36, %v3706_v1  ;;  %v4677_v1 = vpop.permute.xlu0 %2264 }
 0x4dc   :  { %v3718_v57 = vpop.eup %3717  ;;  %v3349_v56 = vpack.c.bf16 %v3716_v2, %v3708_v22 }
 0x4dd   :  { %3184 = vmatmul.mubr.msk.f32.gmra.mrb[86].mxu0 %vm487_vm1, %v3176_v24  ;;  %v3357_v0 = vpack.c.bf16 %v3718_v57, %v3710_v50 }
 0x4de   :  { %3188 = vmatmul.mubr.msk.f32.gmra.mrb[86].mxu1 %vm487_vm1, %v3176_v24  ;;  %3350 = vmatprep.subr.bf16.mxu0 %v3349_v56 }
 0x4df   :  { %3358 = vmatprep.subr.bf16.mxu1 %v3357_v0  ;;  %3352 = vmatpush1.bf16.msra.mxu0 %v3351_v12 }
 0x4e0   :  { %3360 = vmatpush1.bf16.msra.mxu1 %v3359_v11  ;;  %2526 = vmatprep.mubr.f32.mxu0 %v3807_v5  ;;  %v4683_v11 = vpop.permute.xlu1 %2269 }
 0x4e1   :  { %2615 = vmatprep.mubr.f32.mxu1 %v3807_v5 }
 0x4e2   :  { %3189 = vmatmul.mubr.msk.f32.vlgmr.msra.gmra.mrb[88].mxu0 %vm487_vm1, %v3173_v53 }
 0x4e3   :  { %3193 = vmatmul.mubr.msk.f32.vlgmr.msra.gmra.mrb[88].mxu1 %vm487_vm1, %v3173_v53  ;;  %2532 = vmatprep.mubr.f32.mxu0 %v3807_v5 }
 0x4e4   :  { %2621 = vmatprep.mubr.f32.mxu1 %v3807_v5 }
 0x4e6   :  { %3190 = vmatmul.mubr.msk.f32.gmra.mrb[90].mxu0 %vm487_vm1, %v3174_v32 }
 0x4e7   :  { %3194 = vmatmul.mubr.msk.f32.gmra.mrb[90].mxu1 %vm487_vm1, %v3174_v32  ;;  %2538 = vmatprep.mubr.f32.mxu0 %v3807_v5 }
 0x4e8   :  { %2627 = vmatprep.mubr.f32.mxu1 %v3807_v5 }
 0x4ea   :  { %3191 = vmatmul.mubr.msk.f32.gmra.mrb[92].mxu0 %vm487_vm1, %v3175_v45 }
 0x4eb   :  { %3195 = vmatmul.mubr.msk.f32.gmra.mrb[92].mxu1 %vm487_vm1, %v3175_v45  ;;  %2544 = vmatprep.mubr.f32.mxu0 %v3807_v5 }
 0x4ec   :  { %2633 = vmatprep.mubr.f32.mxu1 %v3807_v5 }
 0x4ee   :  { %3192 = vmatmul.mubr.msk.f32.gmra.mrb[94].mxu0 %vm487_vm1, %v3176_v24 }
 0x4ef   :  { %3196 = vmatmul.mubr.msk.f32.gmra.mrb[94].mxu1 %vm487_vm1, %v3176_v24  ;;  %2772 = vmatprep.mubr.f32.mxu0 %v3807_v5 }
 0x4f0   :  { %2843 = vmatprep.mubr.f32.mxu1 %v3807_v5 }
 0x5a4   :  { %v2350_v28 = vpop.f32.mrb[80].mxu0 }
 0x5a5   :  { %v2351_v15 = vadd.f32 %v2350_v28, %v4665_v26  ;;  %v2439_v29 = vpop.f32.mrb[80].mxu1  ;;  %v2352_v53 = vpop.f32.mrb[81].mxu0 }
 0x5a6   :  { %v2440_v59 = vadd.f32 %v2439_v29, %v4665_v26  ;;  %v2353_v4 = vadd.f32 %v2352_v53, %v4665_v26  ;;  %v2441_v61 = vpop.f32.mrb[81].mxu1 }
 0x5a7   :  { %3719 = vtanh.f32 %v2351_v15  ;;  %v2442_v25 = vadd.f32 %v2441_v61, %v4665_v26 }
 0x5a8   :  { %3721 = vtanh.f32 %v2440_v59  ;;  %v2356_v32 = vpop.f32.mrb[82].mxu0 }
 0x5a9   :  { %3723 = vtanh.f32 %v2353_v4  ;;  %v2357_v40 = vadd.f32 %v2356_v32, %v4671_v31  ;;  %v2445_v48 = vpop.f32.mrb[82].mxu1  ;;  %v2358_v55 = vpop.f32.mrb[83].mxu0 }
 0x5aa   :  { %3725 = vtanh.f32 %v2442_v25  ;;  %v2446_v44 = vadd.f32 %v2445_v48, %v4671_v31  ;;  %v2359_v41 = vadd.f32 %v2358_v55, %v4671_v31  ;;  %v2447_v43 = vpop.f32.mrb[83].mxu1 }
 0x5ab   :  { %3727 = vtanh.f32 %v2357_v40  ;;  %v2448_v51 = vadd.f32 %v2447_v43, %v4671_v31 }
 0x5ac   :  { %3729 = vtanh.f32 %v2446_v44  ;;  %v2362_v45 = vpop.f32.mrb[84].mxu0 }
 0x5ad   :  { %3731 = vtanh.f32 %v2359_v41  ;;  %v2363_v22 = vadd.f32 %v2362_v45, %v4677_v1  ;;  %v2451_v50 = vpop.f32.mrb[84].mxu1  ;;  %v2364_v30 = vpop.f32.mrb[85].mxu0 }
 0x5ae   :  { %3733 = vtanh.f32 %v2448_v51  ;;  %v2452_v36 = vadd.f32 %v2451_v50, %v4677_v1  ;;  %v2365_v24 = vadd.f32 %v2364_v30, %v4677_v1  ;;  %v2453_v12 = vpop.f32.mrb[85].mxu1 }
 0x5af   :  { %3735 = vtanh.f32 %v2363_v22  ;;  %v2454_v2 = vadd.f32 %v2453_v12, %v4677_v1 }
 0x5b0   :  { %3737 = vtanh.f32 %v2452_v36  ;;  %v2368_v57 = vpop.f32.mrb[86].mxu0 }
 0x5b1   :  { %v3720_v56 = vpop.eup %3719  ;;  %3739 = vtanh.f32 %v2365_v24  ;;  %v2369_v0 = vadd.f32 %v2368_v57, %v4683_v11  ;;  %v2457_v28 = vpop.f32.mrb[86].mxu1 }
 0x5b2   :  { %v2370_v15 = vpop.f32.mrb[87].mxu0  ;;  %v3722_v29 = vpop.eup %3721  ;;  %3741 = vtanh.f32 %v2454_v2  ;;  %v2458_v53 = vadd.f32 %v2457_v28, %v4683_v11  ;;  %v2672_v55 = vadd.f32 %v3720_v56, %v4397_v9 }
 0x5b3   :  { %v2371_v59 = vadd.f32 %v2370_v15, %v4683_v11  ;;  %v2459_v4 = vpop.f32.mrb[87].mxu1  ;;  %v3724_v61 = vpop.eup %3723  ;;  %3743 = vtanh.f32 %v2369_v0  ;;  %v2674_v22 = vadd.f32 %v3722_v29, %v4413_v49 }
 0x5b4   :  { %v2460_v25 = vadd.f32 %v2459_v4, %v4683_v11  ;;  %v3726_v32 = vpop.eup %3725  ;;  %3745 = vtanh.f32 %v2458_v53  ;;  %v2673_v12 = vadd.f32 %v3724_v61, %v4394_v7 }
 0x5b5   :  { %v3728_v40 = vpop.eup %3727  ;;  %3747 = vtanh.f32 %v2371_v59  ;;  %v2528_v48 = vpop.f32.mrb[88].mxu0  ;;  %v2675_v28 = vadd.f32 %v3726_v32, %v4407_v20 }
 0x5b6   :  { %v3730_v44 = vpop.eup %3729  ;;  %3749 = vtanh.f32 %v2460_v25  ;;  %v2529_v41 = vadd.f32 %v2528_v48, %v4665_v26  ;;  %v2617_v43 = vpop.f32.mrb[88].mxu1  ;;  %v2680_v45 = vadd.f32 %v3728_v40, %v4389_v13 }
 0x5b7   :  { %v2530_v51 = vpop.f32.mrb[89].mxu0  ;;  %v3732_v50 = vpop.eup %3731  ;;  %v2618_v30 = vadd.f32 %v2617_v43, %v4665_v26  ;;  %v2682_v9 = vadd.f32 %v3730_v44, %v4404_v33 }
 0x5b8   :  { %v2531_v36 = vadd.f32 %v2530_v51, %v4665_v26  ;;  %v2619_v24 = vpop.f32.mrb[89].mxu1  ;;  %v3734_v2 = vpop.eup %3733  ;;  %3751 = vtanh.f32 %v2529_v41  ;;  %v2681_v56 = vadd.f32 %v3732_v50, %v4401_v14  ;;  %v3363_v0 = vpack.c.bf16 %v2680_v45, %v2672_v55 }
 0x5b9   :  { %v2620_v57 = vadd.f32 %v2619_v24, %v4665_v26  ;;  %v3736_v13 = vpop.eup %3735  ;;  %3753 = vtanh.f32 %v2618_v30  ;;  %v2534_v49 = vpop.f32.mrb[90].mxu0  ;;  %v2683_v15 = vadd.f32 %v3734_v2, %v4410_v42  ;;  %v3371_v29 = vpack.c.bf16 %v2682_v9, %v2674_v22 }
 0x5ba   :  { %v3738_v53 = vpop.eup %3737  ;;  %3755 = vtanh.f32 %v2531_v36  ;;  %v2535_v7 = vadd.f32 %v2534_v49, %v4671_v31  ;;  %v2623_v33 = vpop.f32.mrb[90].mxu1  ;;  %v3361_v4 = vpack.c.bf16 %v2681_v56, %v2673_v12  ;;  %v2688_v44 = vadd.f32 %v3736_v13, %v4429_v35 }
 0x5bb   :  { %v2536_v59 = vpop.f32.mrb[91].mxu0  ;;  %v3740_v61 = vpop.eup %3739  ;;  %3757 = vtanh.f32 %v2620_v57  ;;  %v2624_v14 = vadd.f32 %v2623_v33, %v4671_v31  ;;  %v3369_v40 = vpack.c.bf16 %v2683_v15, %v2675_v28  ;;  %v2704_v33 = vld [vmem:[%s4762_s4] sm:$0x1]  ;;  %s3810_s4 = smov [#allocation2]  }
 0x5bc   :  { %v2537_v26 = vadd.f32 %v2536_v59, %v4671_v31  ;;  %v2625_v25 = vpop.f32.mrb[91].mxu1  ;;  %v3742_v48 = vpop.eup %3741  ;;  %3759 = vtanh.f32 %v2535_v7  ;;  %3362 = vmatprep.subr.bf16.mxu0 %v3361_v4  ;;  %v2689_v55 = vadd.f32 %v3740_v61, %v4437_v16  ;;  %s3057_s22 = sshll.u32 %s3810_s4, 4  ;;  %s3058_s22 = int_to_ptr.vmem [resolvable:$true] %s3057_s22 }
 0x5bd   :  { %v2626_v20 = vadd.f32 %v2625_v25, %v4671_v31  ;;  %v3744_v42 = vpop.eup %3743  ;;  %3761 = vtanh.f32 %v2624_v14  ;;  %3370 = vmatprep.subr.bf16.mxu1 %v3369_v40  ;;  %v2540_v32 = vpop.f32.mrb[92].mxu0  ;;  %3364 = vmatpush1.bf16.msra.mxu0 %v3363_v0  ;;  %v2690_v31 = vadd.f32 %v3738_v53, %v4453_v60  ;;  %v2691_v60 = vadd.f32 %v3742_v48, %v4447_v23  ;;  %s3783_s23 = scalar_lea.vmem %s3058_s22, 128  ;;  %p3788_p1 = scmp.lt.s32.totalorder %s3058_s22, %s3058_s22 }
 0x5be   :  { %v3746_v41 = vpop.eup %3745  ;;  %3763 = vtanh.f32 %v2537_v26  ;;  %v2541_v43 = vadd.f32 %v2540_v32, %v4677_v1  ;;  %v2629_v51 = vpop.f32.mrb[92].mxu1  ;;  %3372 = vmatpush1.bf16.msra.mxu1 %v3371_v29  ;;  %v2696_v22 = vadd.f32 %v3744_v42, %v4432_v10  ;;  %p3784_p0 = scmp.ne.s32.totalorder %s3058_s22, %s3783_s23  ;;  %p3789_p2 = scmp.lt.s32.totalorder %s3783_s23, %s3783_s23 }
 0x5bf   :  { %v2542_v45 = vpop.f32.mrb[93].mxu0  ;;  %v3748_v50 = vpop.eup %3747  ;;  %3765 = vtanh.f32 %v2626_v20  ;;  %v2630_v30 = vadd.f32 %v2629_v51, %v4677_v1  ;;  %v2698_v35 = vadd.f32 %v3746_v41, %v4444_v63 }
 0x5c0   :  { %v2543_v36 = vadd.f32 %v2542_v45, %v4677_v1  ;;  %v2631_v16 = vpop.f32.mrb[93].mxu1  ;;  %v3750_v24 = vpop.eup %3749  ;;  %3767 = vtanh.f32 %v2541_v43  ;;  %v2697_v9 = vadd.f32 %v3748_v50, %v4441_v52  ;;  %v3367_v2 = vpack.c.bf16 %v2696_v22, %v2688_v44  ;;  %p3790_p3 = por %p3789_p2, %p3788_p1 }
 0x5c1   :  { %v2632_v12 = vadd.f32 %v2631_v16, %v4677_v1  ;;  %3769 = vtanh.f32 %v2630_v30  ;;  %v2546_v10 = vpop.f32.mrb[94].mxu0  ;;  %v2699_v57 = vadd.f32 %v3750_v24, %v4450_v37  ;;  %v3375_v56 = vpack.c.bf16 %v2698_v35, %v2690_v31 }
 0x5c2   :  { %v3752_v0 = vpop.eup %3751  ;;  %3771 = vtanh.f32 %v2543_v36  ;;  %v2547_v13 = vadd.f32 %v2546_v10, %v4683_v11  ;;  %v2635_v49 = vpop.f32.mrb[94].mxu1  ;;  %v3365_v28 = vpack.c.bf16 %v2697_v9, %v2689_v55  ;;  %p3791_p4 = pnand %p3790_p3, %p3784_p0 }
 0x5c3   :  { %v2548_v63 = vpop.f32.mrb[95].mxu0  ;;  %v3754_v15 = vpop.eup %3753  ;;  %3773 = vtanh.f32 %v2632_v12  ;;  %v2636_v1 = vadd.f32 %v2635_v49, %v4683_v11  ;;  %v3373_v53 = vpack.c.bf16 %v2699_v57, %v2691_v60  ;;  %v2676_v61 = vadd.f32 %v3752_v0, %v4500_v58 }
 0x5c4   :  { %v2549_v52 = vadd.f32 %v2548_v63, %v4683_v11  ;;  %v2637_v29 = vpop.f32.mrb[95].mxu1  ;;  %v3756_v7 = vpop.eup %3755  ;;  %3775 = vtanh.f32 %v2547_v13  ;;  %3366 = vmatprep.subr.bf16.mxu0 %v3365_v28 }
 0x5c5   :  { %v2638_v23 = vadd.f32 %v2637_v29, %v4683_v11  ;;  %v3758_v37 = vpop.eup %3757  ;;  %3777 = vtanh.f32 %v2636_v1  ;;  %3374 = vmatprep.subr.bf16.mxu1 %v3373_v53  ;;  %3368 = vmatpush1.bf16.msra.mxu0 %v3367_v2  ;;  %v2678_v11 = vadd.f32 %v3754_v15, %v4505_v21  ;;  %v2677_v48 = vadd.f32 %v3756_v7, %v4484_v34 }
 0x5c6   :  { %v3760_v59 = vpop.eup %3759  ;;  %3779 = vtanh.f32 %v2549_v52  ;;  %3376 = vmatpush1.bf16.msra.mxu1 %v3375_v56 }
 0x5c7   :  { %v3762_v4 = vpop.eup %3761  ;;  %3781 = vtanh.f32 %v2638_v23  ;;  %v2684_v14 = vadd.f32 %v3760_v59, %v4475_v18  ;;  %v2679_v18 = vadd.f32 %v3758_v37, %v4494_v8 }
 0x5c8   :  { %v3764_v26 = vpop.eup %3763  ;;  %3197 = vmatmul.mubr.msk.f32.vlgmr.msra.gmra.mrb[96].mxu0 %vm487_vm1, %v2704_v33  ;;  %v2686_v25 = vadd.f32 %v3762_v4, %v4490_v6 }
 0x5c9   :  { %v3766_v40 = vpop.eup %3765  ;;  %v2685_v20 = vadd.f32 %v3764_v26, %v4487_v39  ;;  %3198 = vmatmul.mubr.msk.f32.vlgmr.msra.gmra.mrb[96].mxu1 %vm487_vm1, %v2704_v33  ;;  %v3379_v42 = vpack.c.bf16 %v2684_v14, %v2676_v61  ;;  %2914 = vmatprep.mubr.f32.mxu0 %v3807_v5 }
 0x5ca   :  { %v3768_v58 = vpop.eup %3767  ;;  %v2687_v32 = vadd.f32 %v3766_v40, %v4497_v27  ;;  %v3387_v55 = vpack.c.bf16 %v2686_v25, %v2678_v11  ;;  %2985 = vmatprep.mubr.f32.mxu1 %v3807_v5 }
 0x5cb   :  { %v3770_v21 = vpop.eup %3769  ;;  %v3377_v6 = vpack.c.bf16 %v2685_v20, %v2677_v48  ;;  %v2692_v51 = vadd.f32 %v3768_v58, %v4546_v54 }
 0x5cc   :  { %v3772_v44 = vpop.eup %3771  ;;  %v3385_v41 = vpack.c.bf16 %v2687_v32, %v2679_v18  ;;  %v2694_v27 = vadd.f32 %v3770_v21, %v4551_v47 }
 0x5cd   :  { %v3774_v34 = vpop.eup %3773  ;;  %3378 = vmatprep.subr.bf16.mxu0 %v3377_v6  ;;  %v2693_v31 = vadd.f32 %v3772_v44, %v4530_v46 }
 0x5ce   :  { %v3776_v39 = vpop.eup %3775  ;;  %3386 = vmatprep.subr.bf16.mxu1 %v3385_v41  ;;  %3380 = vmatpush1.bf16.msra.mxu0 %v3379_v42  ;;  %v2695_v36 = vadd.f32 %v3774_v34, %v4540_v3 }
 0x5cf   :  { %v3778_v43 = vpop.eup %3777  ;;  %3388 = vmatpush1.bf16.msra.mxu1 %v3387_v55  ;;  %v2700_v8 = vadd.f32 %v3776_v39, %v4522_v17  ;;  %v3809_v17 = vmov 1966171168  }
 0x5d0   :  { %v3780_v45 = vpop.eup %3779  ;;  %v2702_v5 = vadd.f32 %v3778_v43, %v4536_v19  ;;  %v3005_v46 = vunpack.c.l.s4 %v3809_v17  ;;  %v3007_v19 = vlaneseq }
 0x5d1   :  { %v3782_v22 = vpop.eup %3781  ;;  %v2701_v50 = vadd.f32 %v3780_v45, %v4533_v62  ;;  %v3383_v30 = vpack.c.bf16 %v2700_v8, %v2692_v51 }
 0x5d2   :  { %v2703_v16 = vadd.f32 %v3782_v22, %v4543_v38  ;;  %v3391_v35 = vpack.c.bf16 %v2702_v5, %v2694_v27  ;;  %v3006_v62 = vunpack.c.0.s8 %v3005_v46  ;;  %v3008_v47 = vshrl.u32 %v3007_v19, 7 }
 0x5d3   :  { %v3381_v24 = vpack.c.bf16 %v2701_v50, %v2693_v31 }
 0x5d4   :  { %v3389_v54 = vpack.c.bf16 %v2703_v16, %v2695_v36  ;;  %v3009_v3 = vsub.s32 %v3006_v62, %v3008_v47 }
 0x5d5   :  { %3382 = vmatprep.subr.bf16.mxu0 %v3381_v24 }
 0x5d6   :  { %3390 = vmatprep.subr.bf16.mxu1 %v3389_v54  ;;  %3384 = vmatpush1.bf16.msra.mxu0 %v3383_v30 }
 0x5d7   :  { %3392 = vmatpush1.bf16.msra.mxu1 %v3391_v35 }
 0x5d9   :  { %3199 = vmatmul.mubr.msk.f32.vlgmr.msra.gmra.mrb[98].mxu0 %vm487_vm1, %v2704_v33 }
 0x5da   :  { %3200 = vmatmul.mubr.msk.f32.vlgmr.msra.gmra.mrb[98].mxu1 %vm487_vm1, %v2704_v33 }
 0x69b   :  { %v2774_v12 = vpop.f32.mrb[96].mxu0 }
 0x69c   :  { %v2845_v9 = vpop.f32.mrb[96].mxu1  ;;  %v2776_v38 = vpop.f32.mrb[97].mxu0 }
 0x69d   :  { %v3000_v2 = vcombine.low %v2774_v12, %v2776_v38  ;;  %v2847_v10 = vpop.f32.mrb[97].mxu1 }
 0x69e   :  { %v3001_v60 = vcombine.low %v2845_v9, %v2847_v10 }
 0x69f   :  { %v3010_v57 = vrot.slane %v3000_v2, %v3009_v3 }
 0x6a0   :  { %v3017_v56 = vrot.slane %v3001_v60, %v3009_v3 }
 0x6a2   :  { %v3032_v0 = vcombine.low %v3010_v57, %v3017_v56 }
 0x6a4   :  { %v3040_v7 = vrot.slane %v3032_v0, %v3009_v3 }
 0x6ac   :  { %v2916_v13 = vpop.f32.mrb[98].mxu0 }
 0x6ad   :  { %v2987_v49 = vpop.f32.mrb[98].mxu1  ;;  %v2918_v63 = vpop.f32.mrb[99].mxu0 }
 0x6ae   :  { %v3002_v28 = vcombine.low %v2916_v13, %v2918_v63  ;;  %v2989_v15 = vpop.f32.mrb[99].mxu1 }
 0x6af   :  { %v3003_v1 = vcombine.low %v2987_v49, %v2989_v15 }
 0x6b0   :  { %v3024_v52 = vrot.slane %v3002_v28, %v3009_v3 }
 0x6b1   :  { %v3031_v29 = vrot.slane %v3003_v1, %v3009_v3 }
 0x6b3   :  { %v3033_v53 = vcombine.low %v3024_v52, %v3031_v29 }
 0x6b5   :  { %v3047_v23 = vrot.slane %v3033_v53, %v3009_v3 }
 0x6b7   :  { %v3048_v37 = vcombine.low %v3040_v7, %v3047_v23 }
 0x6b9   :  { %3050 = vst [vmem:[#allocation2] sm:$0xff] %v3048_v37 }
 0x6ba   :  { %3794 = shalt.err (!%p3791_p4)
}
 0x6bb   :  { %s3795_s26 = scalar_lea.hbm %s4763_s5, 128 }
 0x6bc   :  { %p3796_p5 = scmp.ne.s32.totalorder %s4763_s5, %s3795_s26  ;;  %p3799_p6 = scmp.lt.u32.totalorder %s3795_s26, %s4763_s5 }
 0x6be   :  { %p3801_p7 = pnand %p3799_p6, %p3796_p5 }
 0x6c0   :  { %3804 = shalt.err (!%p3801_p7)
}
 0x6c1   :  { %3060 = dma.vmem_to_hbm [thread:$0]  %s3058_s22, 128, %s4763_s5, [#allocation3]  }
 0x6c2   :  { %3805 = dma.done.wait [#allocation3], 128  }
 0x6c3   :  { %3806 = vsyncadd [#allocation3], 4294967168 }
 0x6c4   :  { %3064 = vsyncpa [#allocation3], 1 }

</bundles_post_ra>
